<compile_context>
chip_gen: v7x
topology: tpu7x:2x2x1
jax: 0.10.0
libtpu: 0.0.40
codegen_flags: <defaults>
</compile_context>

<pallas_src>
import math
from functools import partial

import jax
import jax.numpy as jnp
from jax.experimental import pallas as pl
from jax.experimental.pallas import tpu as pltpu

LANE = 128


def _round_up(x, m):
    return ((x + m - 1) // m) * m


def _pick_tile(L, pref):
    # Full-length tile for short sequences / non-divisible lengths.
    # TODO(synk): pad L for ragged lengths instead of the full-length fallback.
    if L <= pref or L % pref != 0:
        return L
    return pref


def _attblock_kernel(*args, nheads, d_pad, has_side):
    if has_side:
        (xq_ref, xk_ref, side_ref, wq_ref, bq_ref, wkv_ref, bkv_ref,
         wo_ref, bo_ref, wmid_ref, wcond_ref, bmc_ref, wout_ref, bout_ref,
         res_ref, skip_ref, q_s, m_s, l_s, acc_s) = args
    else:
        (xq_ref, xk_ref, wq_ref, bq_ref, wkv_ref, bkv_ref,
         wo_ref, bo_ref, wmid_ref, bmid_ref, wout_ref, bout_ref,
         res_ref, skip_ref, q_s, m_s, l_s, acc_s) = args

    ki = pl.program_id(2)
    nk = pl.num_programs(2)
    H, dp = nheads, d_pad
    Cq = H * dp
    bf16, f32 = jnp.bfloat16, jnp.float32

    xq = xq_ref[0]                            # (TQ, C_pad) f32 query-tile slab
    C_pad = xq.shape[1]

    # ---- per-(b, q-tile) init: Q projection (scale pre-folded) + softmax state ----
    @pl.when(ki == 0)
    def _():
        q = jnp.dot(xq.astype(bf16), wq_ref[...],
                    preferred_element_type=f32) + bq_ref[...]            # (TQ, Cq)
        # per-head 128-aligned, 128-wide slabs -> (H, TQ, dp); lane-dense assembly
        q_s[...] = jnp.stack([q[:, h * dp:(h + 1) * dp] for h in range(H)],
                             axis=0).astype(bf16)
        m_s[...] = jnp.full(m_s.shape, -jnp.inf, dtype=f32)
        l_s[...] = jnp.zeros(l_s.shape, dtype=f32)
        acc_s[...] = jnp.zeros(acc_s.shape, dtype=f32)

    # ---- K/V for this key tile (fused KV matmul), online-softmax update --------
    xk = xk_ref[0].astype(bf16)                                          # (TK, C_pad)
    kv = jnp.dot(xk, wkv_ref[...], preferred_element_type=f32) + bkv_ref[...]  # (TK, 2*Cq)
    kh = jnp.stack([kv[:, h * dp:(h + 1) * dp] for h in range(H)],
                   axis=0).astype(bf16)                                  # (H, TK, dp)
    vh = jnp.stack([kv[:, Cq + h * dp:Cq + (h + 1) * dp] for h in range(H)],
                   axis=0).astype(bf16)                                  # (H, TK, dp)

    # scale already folded into w_q/b_q -> no VPU multiply over the score tensor
    s = jnp.einsum("hqd,hkd->hqk", q_s[...], kh,
                   preferred_element_type=f32)                           # (H, TQ, TK)
    m_prev = m_s[...]
    m_new = jnp.maximum(m_prev, jnp.max(s, axis=-1, keepdims=True))
    alpha = jnp.exp(m_prev - m_new)
    # TODO(synk): on v6e/v7x compute exp/p in bf16 (keep m/l in f32); keep f32 on v5e.
    p = jnp.exp(s - m_new)
    l_s[...] = alpha * l_s[...] + jnp.sum(p, axis=-1, keepdims=True)
    acc_s[...] = alpha * acc_s[...] + jnp.einsum(
        "hqk,hkd->hqd", p.astype(bf16), vh, preferred_element_type=f32)
    m_s[...] = m_new

    # ---- finalize this q-tile: attn out-proj + gated projections + residuals ----
    @pl.when(ki == nk - 1)
    def _():
        oh = acc_s[...] * pl.reciprocal(l_s[...], approx=True)           # (H, TQ, dp)
        o = jnp.concatenate([oh[h] for h in range(H)], axis=-1)          # (TQ, Cq) aligned
        attn = jnp.dot(o.astype(bf16), wo_ref[...],
                       preferred_element_type=f32) + bo_ref[...]         # (TQ, C_pad)
        y = xq + attn                                                    # attention residual

        # mid (+ cond) projection: two K=C matmuls accumulated (no lane-concat buffer)
        ymid = jnp.dot(y.astype(bf16), wmid_ref[...], preferred_element_type=f32)
        if has_side:
            st = side_ref[0].astype(bf16)
            ymid = ymid + jnp.dot(st, wcond_ref[...], preferred_element_type=f32)
            ymid = ymid + bmc_ref[...]
        else:
            ymid = ymid + bmid_ref[...]

        gate = ymid[:, :C_pad]                 # torch.chunk(y, 2, dim=1): first half
        filt = ymid[:, C_pad:]
        yg = jax.nn.sigmoid(gate) * jnp.tanh(filt)                       # f32 elementwise

        yout = jnp.dot(yg.astype(bf16), wout_ref[...],
                       preferred_element_type=f32) + bout_ref[...]       # (TQ, 2*C_pad)
        res_ref[0] = (xq + yout[:, :C_pad]) * (1.0 / math.sqrt(2.0))
        skip_ref[0] = yout[:, C_pad:]


def prepare_params(params, nheads):
    """One-time weight prep: transpose, lane-dense zero-padding of C and per-head d,
    attention-scale folding into w_q/b_q, and bf16 cast of MXU operands."""
    f32, bf16 = jnp.float32, jnp.bfloat16
    p = {k: jnp.asarray(v, f32) for k, v in params.items()}
    C = p["w_q"].shape[0]
    assert C % nheads == 0, "channels must divide evenly across heads"
    d = C // nheads
    C_pad = _round_up(C, LANE)
    d_pad = _round_up(d, LANE)
    Cq = nheads * d_pad
    scale = 1.0 / math.sqrt(d)

    def pad_head_cols(wt):            # (C, H*d) -> (C_pad, H*d_pad)
        w3 = wt.reshape(C, nheads, d)
        w3 = jnp.pad(w3, ((0, C_pad - C), (0, 0), (0, d_pad - d)))
        return w3.reshape(C_pad, Cq)

    def pad_head_bias(b):             # (H*d,) -> (1, H*d_pad)
        b2 = jnp.pad(b.reshape(nheads, d), ((0, 0), (0, d_pad - d)))
        return b2.reshape(1, Cq)

    def pad_head_rows(wt):            # (H*d, C) -> (H*d_pad, C_pad)
        w3 = wt.reshape(nheads, d, C)
        w3 = jnp.pad(w3, ((0, 0), (0, d_pad - d), (0, C_pad - C)))
        return w3.reshape(Cq, C_pad)

    def pad_chunk_cols(wt):           # (C, 2C) -> (C_pad, 2*C_pad); halves padded separately
        w3 = wt.reshape(C, 2, C)
        w3 = jnp.pad(w3, ((0, C_pad - C), (0, 0), (0, C_pad - C)))
        return w3.reshape(C_pad, 2 * C_pad)

    def pad_chunk_bias(b):            # (2C,) -> (1, 2*C_pad)
        b2 = jnp.pad(b.reshape(2, C), ((0, 0), (0, C_pad - C)))
        return b2.reshape(1, 2 * C_pad)

    return {
        # Q projection with 1/sqrt(d) folded into BOTH weight and bias (free at prep).
        "w_q": pad_head_cols(p["w_q"].T * scale).astype(bf16),
        "b_q": pad_head_bias(p["b_q"] * scale),
        # fused K|V projection: (C_pad, 2*Cq)
        "w_kv": jnp.concatenate([pad_head_cols(p["w_k"].T),
                                 pad_head_cols(p["w_v"].T)], axis=1).astype(bf16),
        "b_kv": jnp.concatenate([pad_head_bias(p["b_k"]),
                                 pad_head_bias(p["b_v"])], axis=1),
        "w_o": pad_head_rows(p["w_o"].T).astype(bf16),                    # (Cq, C_pad)
        "b_o": jnp.pad(p["b_o"], (0, C_pad - C))[None, :],
        "w_mid": pad_chunk_cols(p["w_mid"].T).astype(bf16),               # (C_pad, 2*C_pad)
        "b_mid": pad_chunk_bias(p["b_mid"]),
        "w_cond": pad_chunk_cols(p["w_cond"].T).astype(bf16),
        "b_midcond": pad_chunk_bias(p["b_mid"] + p["b_cond"]),            # additive biases
        "w_out": pad_chunk_cols(p["w_out"].T).astype(bf16),
        "b_out": pad_chunk_bias(p["b_out"]),
    }


def att_block_forward(x, side_info, prep, nheads):
    """x: (B, C, L) f32, side_info: (B, C, L) or None.  Returns NCL (res, skip)."""
    B, C, L = x.shape
    C_pad = prep["w_o"].shape[1]
    d_pad = prep["w_q"].shape[1] // nheads
    has_side = side_info is not None

    TQ = _pick_tile(L, 256)
    TK = _pick_tile(L, 512)
    nq, nk = L // TQ, L // TK

    xt = jnp.pad(jnp.transpose(x, (0, 2, 1)).astype(jnp.float32),
                 ((0, 0), (0, 0), (0, C_pad - C)))                        # (B, L, C_pad)

    q_spec = pl.BlockSpec((1, TQ, C_pad), lambda b, qi, ki: (b, qi, 0))
    k_spec = pl.BlockSpec((1, TK, C_pad), lambda b, qi, ki: (b, ki, 0))
    out_spec = pl.BlockSpec((1, TQ, C_pad), lambda b, qi, ki: (b, qi, 0))

    def w_spec(a):                     # grid-invariant (weights/biases), all 2D
        return pl.BlockSpec(a.shape, lambda b, qi, ki: (0, 0))

    if has_side:
        st = jnp.pad(jnp.transpose(side_info, (0, 2, 1)).astype(jnp.float32),
                     ((0, 0), (0, 0), (0, C_pad - C)))
        weights = (prep["w_q"], prep["b_q"], prep["w_kv"], prep["b_kv"],
                   prep["w_o"], prep["b_o"], prep["w_mid"], prep["w_cond"],
                   prep["b_midcond"], prep["w_out"], prep["b_out"])
        operands = (xt, xt, st) + weights
        in_specs = [q_spec, k_spec, q_spec] + [w_spec(w) for w in weights]
    else:
        # trace-time specialization: no zero side tensor, no cond matmul.
        weights = (prep["w_q"], prep["b_q"], prep["w_kv"], prep["b_kv"],
                   prep["w_o"], prep["b_o"], prep["w_mid"], prep["b_mid"],
                   prep["w_out"], prep["b_out"])
        operands = (xt, xt) + weights
        in_specs = [q_spec, k_spec] + [w_spec(w) for w in weights]

    res_p, skip_p = pl.pallas_call(
        partial(_attblock_kernel, nheads=nheads, d_pad=d_pad, has_side=has_side),
        out_shape=(jax.ShapeDtypeStruct((B, L, C_pad), jnp.float32),
                   jax.ShapeDtypeStruct((B, L, C_pad), jnp.float32)),
        grid=(B, nq, nk),
        in_specs=in_specs,
        out_specs=(out_spec, out_spec),
        scratch_shapes=[
            pltpu.VMEM((nheads, TQ, d_pad), jnp.bfloat16),   # cached Q (bf16)
            pltpu.VMEM((nheads, TQ, 1), jnp.float32),        # running max
            pltpu.VMEM((nheads, TQ, 1), jnp.float32),        # running denom
            pltpu.VMEM((nheads, TQ, d_pad), jnp.float32),    # output accumulator
        ],
        compiler_params=pltpu.CompilerParams(
            dimension_semantics=("parallel", "parallel", "arbitrary"),
            vmem_limit_bytes=48 * 1024 * 1024),               # headroom on v7x's 64 MiB
    )(*operands)

    res = jnp.transpose(res_p[:, :, :C], (0, 2, 1))
    skip = jnp.transpose(skip_p[:, :, :C], (0, 2, 1))
    return res, skip


def _att_block_ref(x, side_info, prep, nheads):
    """Pure-JAX mirror of the kernel (same padded weights + bf16 cast points)."""
    f32, bf16 = jnp.float32, jnp.bfloat16
    B, C, L = x.shape
    C_pad = prep["w_o"].shape[1]
    d_pad = prep["w_q"].shape[1] // nheads
    Cq = nheads * d_pad

    xt = jnp.pad(jnp.transpose(x, (0, 2, 1)).astype(f32),
                 ((0, 0), (0, 0), (0, C_pad - C)))

    q = jnp.einsum("blc,cf->blf", xt.astype(bf16), prep["w_q"],
                   preferred_element_type=f32) + prep["b_q"]
    kv = jnp.einsum("blc,cf->blf", xt.astype(bf16), prep["w_kv"],
                    preferred_element_type=f32) + prep["b_kv"]
    k, v = kv[..., :Cq], kv[..., Cq:]

    def split(t):
        return t.reshape(B, L, nheads, d_pad).transpose(0, 2, 1, 3).astype(bf16)

    qh, kh, vh = split(q), split(k), split(v)
    s = jnp.einsum("bhqd,bhkd->bhqk", qh, kh, preferred_element_type=f32)  # scale folded
    s = s - jnp.max(s, axis=-1, keepdims=True)
    e = jnp.exp(s)
    p = e / jnp.sum(e, axis=-1, keepdims=True)
    oh = jnp.einsum("bhqk,bhkd->bhqd", p.astype(bf16), vh, preferred_element_type=f32)
    o = oh.transpose(0, 2, 1, 3).reshape(B, L, Cq)
    attn = jnp.einsum("blc,cf->blf", o.astype(bf16), prep["w_o"],
                      preferred_element_type=f32) + prep["b_o"]
    y = xt + attn

    ymid = jnp.einsum("blc,cf->blf", y.astype(bf16), prep["w_mid"],
                      preferred_element_type=f32)
    if side_info is not None:
        st = jnp.pad(jnp.transpose(side_info, (0, 2, 1)).astype(f32),
                     ((0, 0), (0, 0), (0, C_pad - C)))
        ymid = ymid + jnp.einsum("blc,cf->blf", st.astype(bf16), prep["w_cond"],
                                 preferred_element_type=f32)
        ymid = ymid + prep["b_midcond"]
    else:
        ymid = ymid + prep["b_mid"]

    gate, filt = ymid[..., :C_pad], ymid[..., C_pad:]
    yg = jax.nn.sigmoid(gate) * jnp.tanh(filt)
    yout = jnp.einsum("blc,cf->blf", yg.astype(bf16), prep["w_out"],
                      preferred_element_type=f32) + prep["b_out"]
    residual, skip = yout[..., :C_pad], yout[..., C_pad:]
    res = (xt + residual) / math.sqrt(2.0)
    return (jnp.transpose(res[..., :C], (0, 2, 1)),
            jnp.transpose(skip[..., :C], (0, 2, 1)))


def init_params(key, C):
    """Deterministic synthetic init (Kaiming-normal weights, uniform conv biases)."""
    ks = jax.random.split(key, 14)

    def kn(k, shape, fan_in):
        return jax.random.normal(k, shape, jnp.float32) * math.sqrt(2.0 / fan_in)

    def bu(k, n, fan_in):
        bound = 1.0 / math.sqrt(fan_in)
        return jax.random.uniform(k, (n,), jnp.float32, -bound, bound)

    p = {}
    p["w_q"], p["b_q"] = kn(ks[0], (C, C), C), bu(ks[1], C, C)
    p["w_k"], p["b_k"] = kn(ks[2], (C, C), C), bu(ks[3], C, C)
    p["w_v"], p["b_v"] = kn(ks[4], (C, C), C), bu(ks[5], C, C)
    p["w_o"], p["b_o"] = kn(ks[6], (C, C), C), bu(ks[7], C, C)
    p["w_cond"], p["b_cond"] = kn(ks[8], (2 * C, C), C), bu(ks[9], 2 * C, C)
    p["w_mid"], p["b_mid"] = kn(ks[10], (2 * C, C), C), bu(ks[11], 2 * C, C)
    p["w_out"], p["b_out"] = kn(ks[12], (2 * C, C), C), bu(ks[13], 2 * C, C)
    return p


if __name__ == "__main__":
    B, C, L, nheads = 2, 8, 16, 2
    key = jax.random.PRNGKey(0)
    kx, ks_, kp = jax.random.split(key, 3)

    x = jax.random.normal(kx, (B, C, L), jnp.float32)
    side_info = jax.random.normal(ks_, (B, C, L), jnp.float32)
    prep = prepare_params(init_params(kp, C), nheads)   # one-time weight prep

    # with side_info
    out, skip = jax.block_until_ready(att_block_forward(x, side_info, prep, nheads))
    assert out.shape == (B, C, L) and skip.shape == (B, C, L)
    assert bool(jnp.all(jnp.isfinite(out))) and bool(jnp.all(jnp.isfinite(skip)))
    ref_out, ref_skip = _att_block_ref(x, side_info, prep, nheads)
    assert bool(jnp.allclose(out, ref_out, atol=5e-2, rtol=5e-2))
    assert bool(jnp.allclose(skip, ref_skip, atol=5e-2, rtol=5e-2))

    # side_info=None (specialized path: no cond projection at all)
    out2, skip2 = jax.block_until_ready(att_block_forward(x, None, prep, nheads))
    assert out2.shape == (B, C, L) and skip2.shape == (B, C, L)
    ref_out2, ref_skip2 = _att_block_ref(x, None, prep, nheads)
    assert bool(jnp.allclose(out2, ref_out2, atol=5e-2, rtol=5e-2))
    assert bool(jnp.allclose(skip2, ref_skip2, atol=5e-2, rtol=5e-2))

    print("KERNEL_OK")
</pallas_src>

<mosaic_0001>
module attributes {stable_mosaic.version = 11 : i64} {
  func.func @_attblock_kernel(%arg0: i32, %arg1: i32, %arg2: i32, %arg3: memref<1x16x128xf32, #tpu.memory_space<vmem>>, %arg4: memref<1x16x128xf32, #tpu.memory_space<vmem>>, %arg5: memref<1x16x128xf32, #tpu.memory_space<vmem>>, %arg6: memref<128x256xbf16, #tpu.memory_space<vmem>>, %arg7: memref<1x256xf32, #tpu.memory_space<vmem>>, %arg8: memref<128x512xbf16, #tpu.memory_space<vmem>>, %arg9: memref<1x512xf32, #tpu.memory_space<vmem>>, %arg10: memref<256x128xbf16, #tpu.memory_space<vmem>>, %arg11: memref<1x128xf32, #tpu.memory_space<vmem>>, %arg12: memref<128x256xbf16, #tpu.memory_space<vmem>>, %arg13: memref<128x256xbf16, #tpu.memory_space<vmem>>, %arg14: memref<1x256xf32, #tpu.memory_space<vmem>>, %arg15: memref<128x256xbf16, #tpu.memory_space<vmem>>, %arg16: memref<1x256xf32, #tpu.memory_space<vmem>>, %arg17: memref<1x16x128xf32, #tpu.memory_space<vmem>>, %arg18: memref<1x16x128xf32, #tpu.memory_space<vmem>>, %arg19: memref<2x16x128xbf16, #tpu.memory_space<vmem>>, %arg20: memref<2x16x1xf32, #tpu.memory_space<vmem>>, %arg21: memref<2x16x1xf32, #tpu.memory_space<vmem>>, %arg22: memref<2x16x128xf32, #tpu.memory_space<vmem>>) attributes {dimension_semantics = [#tpu.dimension_semantics<parallel>, #tpu.dimension_semantics<parallel>, #tpu.dimension_semantics<arbitrary>], iteration_bounds = array<i64: 2, 1, 1>, scalar_prefetch = 0 : i64, scratch_operands = 4 : i64, tpu.core_type = #tpu.core_type<tc>, window_params = [{transform_indices = @transform_0, window_bounds = array<i64: 1, 16, 128>}, {transform_indices = @transform_1, window_bounds = array<i64: 1, 16, 128>}, {transform_indices = @transform_2, window_bounds = array<i64: 1, 16, 128>}, {pipeline_mode = #tpu.pipeline_mode<synchronous>, transform_indices = @transform_3, window_bounds = array<i64: 128, 256>}, {pipeline_mode = #tpu.pipeline_mode<synchronous>, transform_indices = @transform_4, window_bounds = array<i64: 1, 256>}, {pipeline_mode = #tpu.pipeline_mode<synchronous>, transform_indices = @transform_5, window_bounds = array<i64: 128, 512>}, {pipeline_mode = #tpu.pipeline_mode<synchronous>, transform_indices = @transform_6, window_bounds = array<i64: 1, 512>}, {pipeline_mode = #tpu.pipeline_mode<synchronous>, transform_indices = @transform_7, window_bounds = array<i64: 256, 128>}, {pipeline_mode = #tpu.pipeline_mode<synchronous>, transform_indices = @transform_8, window_bounds = array<i64: 1, 128>}, {pipeline_mode = #tpu.pipeline_mode<synchronous>, transform_indices = @transform_9, window_bounds = array<i64: 128, 256>}, {pipeline_mode = #tpu.pipeline_mode<synchronous>, transform_indices = @transform_10, window_bounds = array<i64: 128, 256>}, {pipeline_mode = #tpu.pipeline_mode<synchronous>, transform_indices = @transform_11, window_bounds = array<i64: 1, 256>}, {pipeline_mode = #tpu.pipeline_mode<synchronous>, transform_indices = @transform_12, window_bounds = array<i64: 128, 256>}, {pipeline_mode = #tpu.pipeline_mode<synchronous>, transform_indices = @transform_13, window_bounds = array<i64: 1, 256>}, {transform_indices = @transform_14, window_bounds = array<i64: 1, 16, 128>}, {transform_indices = @transform_15, window_bounds = array<i64: 1, 16, 128>}]} {
    %c0 = arith.constant 0 : index
    %c0_0 = arith.constant 0 : index
    %c0_1 = arith.constant 0 : index
    %0 = vector.load %arg3[%c0, %c0_0, %c0_1] : memref<1x16x128xf32, #tpu.memory_space<vmem>>, vector<1x16x128xf32>
    %1 = vector.shape_cast %0 : vector<1x16x128xf32> to vector<16x128xf32>
    %c0_i32 = arith.constant 0 : i32
    %2 = arith.cmpi eq, %arg2, %c0_i32 : i32
    %3 = arith.extui %2 : i1 to i32
    %c0_i32_2 = arith.constant 0 : i32
    %4 = arith.cmpi ne, %3, %c0_i32_2 : i32
    scf.if %4 {
      %53 = arith.truncf %1 : vector<16x128xf32> to vector<16x128xbf16>
      %c0_37 = arith.constant 0 : index
      %c0_38 = arith.constant 0 : index
      %54 = vector.load %arg6[%c0_37, %c0_38] : memref<128x256xbf16, #tpu.memory_space<vmem>>, vector<128x256xbf16>
      %cst_39 = arith.constant dense<0.000000e+00> : vector<16x256xf32>
      %55 = tpu.matmul %53, %54, %cst_39 {dimension_numbers = #tpu.dot_dimension_numbers<[1], [0], [0], [1], [0, 0, 1, 1], [], []>} : vector<16x128xbf16>, vector<128x256xbf16>, vector<16x256xf32> -> vector<16x256xf32>
      %c0_40 = arith.constant 0 : index
      %c0_41 = arith.constant 0 : index
      %56 = vector.load %arg7[%c0_40, %c0_41] : memref<1x256xf32, #tpu.memory_space<vmem>>, vector<1x256xf32>
      %57 = vector.broadcast %56 : vector<1x256xf32> to vector<16x256xf32>
      %58 = arith.addf %55, %57 : vector<16x256xf32>
      %59 = vector.extract_strided_slice %58 {offsets = [0, 0], sizes = [16, 128], strides = [1, 1]} : vector<16x256xf32> to vector<16x128xf32>
      %60 = vector.extract_strided_slice %58 {offsets = [0, 128], sizes = [16, 128], strides = [1, 1]} : vector<16x256xf32> to vector<16x128xf32>
      %61 = vector.shape_cast %59 : vector<16x128xf32> to vector<1x16x128xf32>
      %62 = vector.shape_cast %60 : vector<16x128xf32> to vector<1x16x128xf32>
      %63 = tpu.concatenate %61, %62 in 0 : vector<1x16x128xf32>, vector<1x16x128xf32> -> vector<2x16x128xf32>
      %64 = arith.truncf %63 : vector<2x16x128xf32> to vector<2x16x128xbf16>
      %c0_42 = arith.constant 0 : index
      %c0_43 = arith.constant 0 : index
      %c0_44 = arith.constant 0 : index
      %65 = vector.load %arg19[%c0_42, %c0_43, %c0_44] : memref<2x16x128xbf16, #tpu.memory_space<vmem>>, vector<2x16x128xbf16>
      tpu.vector_store %arg19[%c0_42, %c0_43, %c0_44], %64 {strides = array<i32>} : memref<2x16x128xbf16, #tpu.memory_space<vmem>>, vector<2x16x128xbf16>,
      %cst_45 = arith.constant 0xFF800000 : f32
      %66 = vector.broadcast %cst_45 : f32 to vector<2x16x1xf32>
      %c0_46 = arith.constant 0 : index
      %c0_47 = arith.constant 0 : index
      %c0_48 = arith.constant 0 : index
      %67 = vector.load %arg20[%c0_46, %c0_47, %c0_48] : memref<2x16x1xf32, #tpu.memory_space<vmem>>, vector<2x16x1xf32>
      tpu.vector_store %arg20[%c0_46, %c0_47, %c0_48], %66 {strides = array<i32>} : memref<2x16x1xf32, #tpu.memory_space<vmem>>, vector<2x16x1xf32>,
      %cst_49 = arith.constant 0.000000e+00 : f32
      %68 = vector.broadcast %cst_49 : f32 to vector<2x16x1xf32>
      %c0_50 = arith.constant 0 : index
      %c0_51 = arith.constant 0 : index
      %c0_52 = arith.constant 0 : index
      %69 = vector.load %arg21[%c0_50, %c0_51, %c0_52] : memref<2x16x1xf32, #tpu.memory_space<vmem>>, vector<2x16x1xf32>
      tpu.vector_store %arg21[%c0_50, %c0_51, %c0_52], %68 {strides = array<i32>} : memref<2x16x1xf32, #tpu.memory_space<vmem>>, vector<2x16x1xf32>,
      %cst_53 = arith.constant 0.000000e+00 : f32
      %70 = vector.broadcast %cst_53 : f32 to vector<2x16x128xf32>
      %c0_54 = arith.constant 0 : index
      %c0_55 = arith.constant 0 : index
      %c0_56 = arith.constant 0 : index
      %71 = vector.load %arg22[%c0_54, %c0_55, %c0_56] : memref<2x16x128xf32, #tpu.memory_space<vmem>>, vector<2x16x128xf32>
      tpu.vector_store %arg22[%c0_54, %c0_55, %c0_56], %70 {strides = array<i32>} : memref<2x16x128xf32, #tpu.memory_space<vmem>>, vector<2x16x128xf32>,
    } else {
    }
    %c0_3 = arith.constant 0 : index
    %c0_4 = arith.constant 0 : index
    %c0_5 = arith.constant 0 : index
    %5 = vector.load %arg4[%c0_3, %c0_4, %c0_5] : memref<1x16x128xf32, #tpu.memory_space<vmem>>, vector<1x16x128xf32>
    %6 = vector.shape_cast %5 : vector<1x16x128xf32> to vector<16x128xf32>
    %7 = arith.truncf %6 : vector<16x128xf32> to vector<16x128xbf16>
    %c0_6 = arith.constant 0 : index
    %c0_7 = arith.constant 0 : index
    %8 = vector.load %arg8[%c0_6, %c0_7] : memref<128x512xbf16, #tpu.memory_space<vmem>>, vector<128x512xbf16>
    %cst = arith.constant dense<0.000000e+00> : vector<16x512xf32>
    %9 = tpu.matmul %7, %8, %cst {dimension_numbers = #tpu.dot_dimension_numbers<[1], [0], [0], [1], [0, 0, 1, 1], [], []>} : vector<16x128xbf16>, vector<128x512xbf16>, vector<16x512xf32> -> vector<16x512xf32>
    %c0_8 = arith.constant 0 : index
    %c0_9 = arith.constant 0 : index
    %10 = vector.load %arg9[%c0_8, %c0_9] : memref<1x512xf32, #tpu.memory_space<vmem>>, vector<1x512xf32>
    %11 = vector.broadcast %10 : vector<1x512xf32> to vector<16x512xf32>
    %12 = arith.addf %9, %11 : vector<16x512xf32>
    %13 = vector.extract_strided_slice %12 {offsets = [0, 0], sizes = [16, 128], strides = [1, 1]} : vector<16x512xf32> to vector<16x128xf32>
    %14 = vector.extract_strided_slice %12 {offsets = [0, 128], sizes = [16, 128], strides = [1, 1]} : vector<16x512xf32> to vector<16x128xf32>
    %15 = vector.shape_cast %13 : vector<16x128xf32> to vector<1x16x128xf32>
    %16 = vector.shape_cast %14 : vector<16x128xf32> to vector<1x16x128xf32>
    %17 = tpu.concatenate %15, %16 in 0 : vector<1x16x128xf32>, vector<1x16x128xf32> -> vector<2x16x128xf32>
    %18 = arith.truncf %17 : vector<2x16x128xf32> to vector<2x16x128xbf16>
    %19 = vector.extract_strided_slice %12 {offsets = [0, 256], sizes = [16, 128], strides = [1, 1]} : vector<16x512xf32> to vector<16x128xf32>
    %20 = vector.extract_strided_slice %12 {offsets = [0, 384], sizes = [16, 128], strides = [1, 1]} : vector<16x512xf32> to vector<16x128xf32>
    %21 = vector.shape_cast %19 : vector<16x128xf32> to vector<1x16x128xf32>
    %22 = vector.shape_cast %20 : vector<16x128xf32> to vector<1x16x128xf32>
    %23 = tpu.concatenate %21, %22 in 0 : vector<1x16x128xf32>, vector<1x16x128xf32> -> vector<2x16x128xf32>
    %24 = arith.truncf %23 : vector<2x16x128xf32> to vector<2x16x128xbf16>
    %c0_10 = arith.constant 0 : index
    %c0_11 = arith.constant 0 : index
    %c0_12 = arith.constant 0 : index
    %25 = vector.load %arg19[%c0_10, %c0_11, %c0_12] : memref<2x16x128xbf16, #tpu.memory_space<vmem>>, vector<2x16x128xbf16>
    "tpu.trace_start"() <{level = 10 : i32, message = "hqd,hkd->hqk"}> : () -> ()
    %cst_13 = arith.constant dense<0.000000e+00> : vector<2x16x16xf32>
    %26 = tpu.matmul %25, %18, %cst_13 {dimension_numbers = #tpu.dot_dimension_numbers<[2], [2], [1], [1], [0, 0, 0, 1, 1, 1], [0], [0]>} : vector<2x16x128xbf16>, vector<2x16x128xbf16>, vector<2x16x16xf32> -> vector<2x16x16xf32>
    "tpu.trace_stop"() : () -> ()
    %c0_14 = arith.constant 0 : index
    %c0_15 = arith.constant 0 : index
    %c0_16 = arith.constant 0 : index
    %27 = vector.load %arg20[%c0_14, %c0_15, %c0_16] : memref<2x16x1xf32, #tpu.memory_space<vmem>>, vector<2x16x1xf32>
    %cst_17 = arith.constant dense<0xFF800000> : vector<2x16xf32>
    %28 = vector.multi_reduction <maximumf>, %26, %cst_17 [2] : vector<2x16x16xf32> to vector<2x16xf32>
    %29 = vector.shape_cast %28 : vector<2x16xf32> to vector<2x16x1xf32>
    %30 = arith.maximumf %27, %29 : vector<2x16x1xf32>
    %31 = arith.subf %27, %30 : vector<2x16x1xf32>
    %32 = math.exp %31 : vector<2x16x1xf32>
    %33 = vector.broadcast %30 : vector<2x16x1xf32> to vector<2x16x16xf32>
    %34 = arith.subf %26, %33 : vector<2x16x16xf32>
    %35 = math.exp %34 : vector<2x16x16xf32>
    %c0_18 = arith.constant 0 : index
    %c0_19 = arith.constant 0 : index
    %c0_20 = arith.constant 0 : index
    %36 = vector.load %arg21[%c0_18, %c0_19, %c0_20] : memref<2x16x1xf32, #tpu.memory_space<vmem>>, vector<2x16x1xf32>
    %37 = arith.mulf %32, %36 : vector<2x16x1xf32>
    %cst_21 = arith.constant dense<0.000000e+00> : vector<2x16xf32>
    %38 = vector.multi_reduction <add>, %35, %cst_21 [2] : vector<2x16x16xf32> to vector<2x16xf32>
    %39 = vector.shape_cast %38 : vector<2x16xf32> to vector<2x16x1xf32>
    %40 = arith.addf %37, %39 : vector<2x16x1xf32>
    %c0_22 = arith.constant 0 : index
    %c0_23 = arith.constant 0 : index
    %c0_24 = arith.constant 0 : index
    %41 = vector.load %arg21[%c0_22, %c0_23, %c0_24] : memref<2x16x1xf32, #tpu.memory_space<vmem>>, vector<2x16x1xf32>
    tpu.vector_store %arg21[%c0_22, %c0_23, %c0_24], %40 {strides = array<i32>} : memref<2x16x1xf32, #tpu.memory_space<vmem>>, vector<2x16x1xf32>,
    %c0_25 = arith.constant 0 : index
    %c0_26 = arith.constant 0 : index
    %c0_27 = arith.constant 0 : index
    %42 = vector.load %arg22[%c0_25, %c0_26, %c0_27] : memref<2x16x128xf32, #tpu.memory_space<vmem>>, vector<2x16x128xf32>
    %43 = vector.broadcast %32 : vector<2x16x1xf32> to vector<2x16x128xf32>
    %44 = arith.mulf %43, %42 : vector<2x16x128xf32>
    %45 = arith.truncf %35 : vector<2x16x16xf32> to vector<2x16x16xbf16>
    "tpu.trace_start"() <{level = 10 : i32, message = "hqk,hkd->hqd"}> : () -> ()
    %cst_28 = arith.constant dense<0.000000e+00> : vector<2x16x128xf32>
    %46 = tpu.matmul %45, %24, %cst_28 {dimension_numbers = #tpu.dot_dimension_numbers<[2], [1], [1], [2], [0, 0, 0, 1, 1, 2], [0], [0]>} : vector<2x16x16xbf16>, vector<2x16x128xbf16>, vector<2x16x128xf32> -> vector<2x16x128xf32>
    "tpu.trace_stop"() : () -> ()
    %47 = arith.addf %44, %46 : vector<2x16x128xf32>
    %c0_29 = arith.constant 0 : index
    %c0_30 = arith.constant 0 : index
    %c0_31 = arith.constant 0 : index
    %48 = vector.load %arg22[%c0_29, %c0_30, %c0_31] : memref<2x16x128xf32, #tpu.memory_space<vmem>>, vector<2x16x128xf32>
    tpu.vector_store %arg22[%c0_29, %c0_30, %c0_31], %47 {strides = array<i32>} : memref<2x16x128xf32, #tpu.memory_space<vmem>>, vector<2x16x128xf32>,
    %c0_32 = arith.constant 0 : index
    %c0_33 = arith.constant 0 : index
    %c0_34 = arith.constant 0 : index
    %49 = vector.load %arg20[%c0_32, %c0_33, %c0_34] : memref<2x16x1xf32, #tpu.memory_space<vmem>>, vector<2x16x1xf32>
    tpu.vector_store %arg20[%c0_32, %c0_33, %c0_34], %30 {strides = array<i32>} : memref<2x16x1xf32, #tpu.memory_space<vmem>>, vector<2x16x1xf32>,
    %c0_i32_35 = arith.constant 0 : i32
    %50 = arith.cmpi eq, %arg2, %c0_i32_35 : i32
    %51 = arith.extui %50 : i1 to i32
    %c0_i32_36 = arith.constant 0 : i32
    %52 = arith.cmpi ne, %51, %c0_i32_36 : i32
    scf.if %52 {
      %c0_37 = arith.constant 0 : index
      %c0_38 = arith.constant 0 : index
      %c0_39 = arith.constant 0 : index
      %53 = vector.load %arg22[%c0_37, %c0_38, %c0_39] : memref<2x16x128xf32, #tpu.memory_space<vmem>>, vector<2x16x128xf32>
      %c0_40 = arith.constant 0 : index
      %c0_41 = arith.constant 0 : index
      %c0_42 = arith.constant 0 : index
      %54 = vector.load %arg21[%c0_40, %c0_41, %c0_42] : memref<2x16x1xf32, #tpu.memory_space<vmem>>, vector<2x16x1xf32>
      %55 = tpu.reciprocal %54 {approx = true} : vector<2x16x1xf32> -> vector<2x16x1xf32>
      %56 = vector.broadcast %55 : vector<2x16x1xf32> to vector<2x16x128xf32>
      %57 = arith.mulf %53, %56 : vector<2x16x128xf32>
      %58 = vector.extract_strided_slice %57 {offsets = [0, 0, 0], sizes = [1, 16, 128], strides = [1, 1, 1]} : vector<2x16x128xf32> to vector<1x16x128xf32>
      %59 = vector.shape_cast %58 : vector<1x16x128xf32> to vector<16x128xf32>
      %60 = vector.extract_strided_slice %57 {offsets = [1, 0, 0], sizes = [1, 16, 128], strides = [1, 1, 1]} : vector<2x16x128xf32> to vector<1x16x128xf32>
      %61 = vector.shape_cast %60 : vector<1x16x128xf32> to vector<16x128xf32>
      %62 = tpu.concatenate %59, %61 in 1 : vector<16x128xf32>, vector<16x128xf32> -> vector<16x256xf32>
      %63 = arith.truncf %62 : vector<16x256xf32> to vector<16x256xbf16>
      %c0_43 = arith.constant 0 : index
      %c0_44 = arith.constant 0 : index
      %64 = vector.load %arg10[%c0_43, %c0_44] : memref<256x128xbf16, #tpu.memory_space<vmem>>, vector<256x128xbf16>
      %cst_45 = arith.constant dense<0.000000e+00> : vector<16x128xf32>
      %65 = tpu.matmul %63, %64, %cst_45 {dimension_numbers = #tpu.dot_dimension_numbers<[1], [0], [0], [1], [0, 0, 1, 1], [], []>} : vector<16x256xbf16>, vector<256x128xbf16>, vector<16x128xf32> -> vector<16x128xf32>
      %c0_46 = arith.constant 0 : index
      %c0_47 = arith.constant 0 : index
      %66 = vector.load %arg11[%c0_46, %c0_47] : memref<1x128xf32, #tpu.memory_space<vmem>>, vector<1x128xf32>
      %67 = vector.broadcast %66 : vector<1x128xf32> to vector<16x128xf32>
      %68 = arith.addf %65, %67 : vector<16x128xf32>
      %69 = arith.addf %1, %68 : vector<16x128xf32>
      %70 = arith.truncf %69 : vector<16x128xf32> to vector<16x128xbf16>
      %c0_48 = arith.constant 0 : index
      %c0_49 = arith.constant 0 : index
      %71 = vector.load %arg12[%c0_48, %c0_49] : memref<128x256xbf16, #tpu.memory_space<vmem>>, vector<128x256xbf16>
      %cst_50 = arith.constant dense<0.000000e+00> : vector<16x256xf32>
      %72 = tpu.matmul %70, %71, %cst_50 {dimension_numbers = #tpu.dot_dimension_numbers<[1], [0], [0], [1], [0, 0, 1, 1], [], []>} : vector<16x128xbf16>, vector<128x256xbf16>, vector<16x256xf32> -> vector<16x256xf32>
      %c0_51 = arith.constant 0 : index
      %c0_52 = arith.constant 0 : index
      %c0_53 = arith.constant 0 : index
      %73 = vector.load %arg5[%c0_51, %c0_52, %c0_53] : memref<1x16x128xf32, #tpu.memory_space<vmem>>, vector<1x16x128xf32>
      %74 = vector.shape_cast %73 : vector<1x16x128xf32> to vector<16x128xf32>
      %75 = arith.truncf %74 : vector<16x128xf32> to vector<16x128xbf16>
      %c0_54 = arith.constant 0 : index
      %c0_55 = arith.constant 0 : index
      %76 = vector.load %arg13[%c0_54, %c0_55] : memref<128x256xbf16, #tpu.memory_space<vmem>>, vector<128x256xbf16>
      %cst_56 = arith.constant dense<0.000000e+00> : vector<16x256xf32>
      %77 = tpu.matmul %75, %76, %cst_56 {dimension_numbers = #tpu.dot_dimension_numbers<[1], [0], [0], [1], [0, 0, 1, 1], [], []>} : vector<16x128xbf16>, vector<128x256xbf16>, vector<16x256xf32> -> vector<16x256xf32>
      %78 = arith.addf %72, %77 : vector<16x256xf32>
      %c0_57 = arith.constant 0 : index
      %c0_58 = arith.constant 0 : index
      %79 = vector.load %arg14[%c0_57, %c0_58] : memref<1x256xf32, #tpu.memory_space<vmem>>, vector<1x256xf32>
      %80 = vector.broadcast %79 : vector<1x256xf32> to vector<16x256xf32>
      %81 = arith.addf %78, %80 : vector<16x256xf32>
      %82 = vector.extract_strided_slice %81 {offsets = [0, 0], sizes = [16, 128], strides = [1, 1]} : vector<16x256xf32> to vector<16x128xf32>
      %83 = vector.extract_strided_slice %81 {offsets = [0, 128], sizes = [16, 128], strides = [1, 1]} : vector<16x256xf32> to vector<16x128xf32>
      %84 = arith.negf %82 : vector<16x128xf32>
      %85 = math.exp %84 : vector<16x128xf32>
      %cst_59 = arith.constant 1.000000e+00 : f32
      %86 = vector.broadcast %cst_59 : f32 to vector<16x128xf32>
      %87 = arith.addf %86, %85 : vector<16x128xf32>
      %88 = arith.divf %86, %87 : vector<16x128xf32>
      %89 = math.tanh %83 : vector<16x128xf32>
      %90 = arith.mulf %88, %89 : vector<16x128xf32>
      %91 = arith.truncf %90 : vector<16x128xf32> to vector<16x128xbf16>
      %c0_60 = arith.constant 0 : index
      %c0_61 = arith.constant 0 : index
      %92 = vector.load %arg15[%c0_60, %c0_61] : memref<128x256xbf16, #tpu.memory_space<vmem>>, vector<128x256xbf16>
      %cst_62 = arith.constant dense<0.000000e+00> : vector<16x256xf32>
      %93 = tpu.matmul %91, %92, %cst_62 {dimension_numbers = #tpu.dot_dimension_numbers<[1], [0], [0], [1], [0, 0, 1, 1], [], []>} : vector<16x128xbf16>, vector<128x256xbf16>, vector<16x256xf32> -> vector<16x256xf32>
      %c0_63 = arith.constant 0 : index
      %c0_64 = arith.constant 0 : index
      %94 = vector.load %arg16[%c0_63, %c0_64] : memref<1x256xf32, #tpu.memory_space<vmem>>, vector<1x256xf32>
      %95 = vector.broadcast %94 : vector<1x256xf32> to vector<16x256xf32>
      %96 = arith.addf %93, %95 : vector<16x256xf32>
      %97 = vector.extract_strided_slice %96 {offsets = [0, 0], sizes = [16, 128], strides = [1, 1]} : vector<16x256xf32> to vector<16x128xf32>
      %98 = arith.addf %1, %97 : vector<16x128xf32>
      %cst_65 = arith.constant 0.707106769 : f32
      %99 = vector.broadcast %cst_65 : f32 to vector<16x128xf32>
      %100 = arith.mulf %98, %99 : vector<16x128xf32>
      %c0_66 = arith.constant 0 : index
      %c0_67 = arith.constant 0 : index
      %c0_68 = arith.constant 0 : index
      %101 = vector.load %arg17[%c0_66, %c0_67, %c0_68] : memref<1x16x128xf32, #tpu.memory_space<vmem>>, vector<1x16x128xf32>
      %102 = vector.shape_cast %101 : vector<1x16x128xf32> to vector<16x128xf32>
      %103 = vector.shape_cast %100 : vector<16x128xf32> to vector<1x16x128xf32>
      tpu.vector_store %arg17[%c0_66, %c0_67, %c0_68], %103 {strides = array<i32>} : memref<1x16x128xf32, #tpu.memory_space<vmem>>, vector<1x16x128xf32>,
      %104 = vector.extract_strided_slice %96 {offsets = [0, 128], sizes = [16, 128], strides = [1, 1]} : vector<16x256xf32> to vector<16x128xf32>
      %c0_69 = arith.constant 0 : index
      %c0_70 = arith.constant 0 : index
      %c0_71 = arith.constant 0 : index
      %105 = vector.load %arg18[%c0_69, %c0_70, %c0_71] : memref<1x16x128xf32, #tpu.memory_space<vmem>>, vector<1x16x128xf32>
      %106 = vector.shape_cast %105 : vector<1x16x128xf32> to vector<16x128xf32>
      %107 = vector.shape_cast %104 : vector<16x128xf32> to vector<1x16x128xf32>
      tpu.vector_store %arg18[%c0_69, %c0_70, %c0_71], %107 {strides = array<i32>} : memref<1x16x128xf32, #tpu.memory_space<vmem>>, vector<1x16x128xf32>,
    } else {
    }
    return
  }
  func.func @transform_0(%arg0: i32, %arg1: i32, %arg2: i32) -> (i32, i32, i32) {
    %c0_i32 = arith.constant 0 : i32
    %c0_i32_0 = arith.constant 0 : i32
    return %arg0, %arg1, %c0_i32 : i32, i32, i32
  }
  func.func @transform_1(%arg0: i32, %arg1: i32, %arg2: i32) -> (i32, i32, i32) {
    %c0_i32 = arith.constant 0 : i32
    %c0_i32_0 = arith.constant 0 : i32
    return %arg0, %arg2, %c0_i32 : i32, i32, i32
  }
  func.func @transform_2(%arg0: i32, %arg1: i32, %arg2: i32) -> (i32, i32, i32) {
    %c0_i32 = arith.constant 0 : i32
    %c0_i32_0 = arith.constant 0 : i32
    return %arg0, %arg1, %c0_i32 : i32, i32, i32
  }
  func.func @transform_3(%arg0: i32, %arg1: i32, %arg2: i32) -> (i32, i32) {
    %c0_i32 = arith.constant 0 : i32
    %c0_i32_0 = arith.constant 0 : i32
    %c0_i32_1 = arith.constant 0 : i32
    return %c0_i32, %c0_i32_0 : i32, i32
  }
  func.func @transform_4(%arg0: i32, %arg1: i32, %arg2: i32) -> (i32, i32) {
    %c0_i32 = arith.constant 0 : i32
    %c0_i32_0 = arith.constant 0 : i32
    %c0_i32_1 = arith.constant 0 : i32
    return %c0_i32, %c0_i32_0 : i32, i32
  }
  func.func @transform_5(%arg0: i32, %arg1: i32, %arg2: i32) -> (i32, i32) {
    %c0_i32 = arith.constant 0 : i32
    %c0_i32_0 = arith.constant 0 : i32
    %c0_i32_1 = arith.constant 0 : i32
    return %c0_i32, %c0_i32_0 : i32, i32
  }
  func.func @transform_6(%arg0: i32, %arg1: i32, %arg2: i32) -> (i32, i32) {
    %c0_i32 = arith.constant 0 : i32
    %c0_i32_0 = arith.constant 0 : i32
    %c0_i32_1 = arith.constant 0 : i32
    return %c0_i32, %c0_i32_0 : i32, i32
  }
  func.func @transform_7(%arg0: i32, %arg1: i32, %arg2: i32) -> (i32, i32) {
    %c0_i32 = arith.constant 0 : i32
    %c0_i32_0 = arith.constant 0 : i32
    %c0_i32_1 = arith.constant 0 : i32
    return %c0_i32, %c0_i32_0 : i32, i32
  }
  func.func @transform_8(%arg0: i32, %arg1: i32, %arg2: i32) -> (i32, i32) {
    %c0_i32 = arith.constant 0 : i32
    %c0_i32_0 = arith.constant 0 : i32
    %c0_i32_1 = arith.constant 0 : i32
    return %c0_i32, %c0_i32_0 : i32, i32
  }
  func.func @transform_9(%arg0: i32, %arg1: i32, %arg2: i32) -> (i32, i32) {
    %c0_i32 = arith.constant 0 : i32
    %c0_i32_0 = arith.constant 0 : i32
    %c0_i32_1 = arith.constant 0 : i32
    return %c0_i32, %c0_i32_0 : i32, i32
  }
  func.func @transform_10(%arg0: i32, %arg1: i32, %arg2: i32) -> (i32, i32) {
    %c0_i32 = arith.constant 0 : i32
    %c0_i32_0 = arith.constant 0 : i32
    %c0_i32_1 = arith.constant 0 : i32
    return %c0_i32, %c0_i32_0 : i32, i32
  }
  func.func @transform_11(%arg0: i32, %arg1: i32, %arg2: i32) -> (i32, i32) {
    %c0_i32 = arith.constant 0 : i32
    %c0_i32_0 = arith.constant 0 : i32
    %c0_i32_1 = arith.constant 0 : i32
    return %c0_i32, %c0_i32_0 : i32, i32
  }
  func.func @transform_12(%arg0: i32, %arg1: i32, %arg2: i32) -> (i32, i32) {
    %c0_i32 = arith.constant 0 : i32
    %c0_i32_0 = arith.constant 0 : i32
    %c0_i32_1 = arith.constant 0 : i32
    return %c0_i32, %c0_i32_0 : i32, i32
  }
  func.func @transform_13(%arg0: i32, %arg1: i32, %arg2: i32) -> (i32, i32) {
    %c0_i32 = arith.constant 0 : i32
    %c0_i32_0 = arith.constant 0 : i32
    %c0_i32_1 = arith.constant 0 : i32
    return %c0_i32, %c0_i32_0 : i32, i32
  }
  func.func @transform_14(%arg0: i32, %arg1: i32, %arg2: i32) -> (i32, i32, i32) {
    %c0_i32 = arith.constant 0 : i32
    %c0_i32_0 = arith.constant 0 : i32
    return %arg0, %arg1, %c0_i32 : i32, i32, i32
  }
  func.func @transform_15(%arg0: i32, %arg1: i32, %arg2: i32) -> (i32, i32, i32) {
    %c0_i32 = arith.constant 0 : i32
    %c0_i32_0 = arith.constant 0 : i32
    return %arg0, %arg1, %c0_i32 : i32, i32, i32
  }
}

</mosaic_0001>

<bundles_post_ra>
// kernel: tpu_custom_call.1
= control target key start
LH: loop header
LB: loop body
LE: loop exit
PB: predicated region body
PF: predicated region fallthrough
CT: control target
= control target key end

     0   :  { %s4175_s0 = inlined_call_operand.hbm [shape: f32[2,16,128], index: 0, kind: input, shape index: {}]   ;;  %s4176_s1 = inlined_call_operand.hbm [shape: f32[2,16,128], index: 1, kind: input, shape index: {}]   ;;  %s4177_s2 = inlined_call_operand.hbm [shape: f32[2,16,128], index: 2, kind: input, shape index: {}]   ;;  %s4178_s3 = inlined_call_operand.hbm [shape: bf16[128,256], index: 3, kind: input, shape index: {}]   ;;  %s4179_s4 = inlined_call_operand.vmem [shape: f32[1,256], index: 4, kind: input, shape index: {}]   ;;  %s4180_s5 = inlined_call_operand.hbm [shape: bf16[128,512], index: 5, kind: input, shape index: {}]   ;;  %s4181_s6 = inlined_call_operand.vmem [shape: f32[1,512], index: 6, kind: input, shape index: {}]   ;;  %s4182_s7 = inlined_call_operand.hbm [shape: bf16[256,128], index: 7, kind: input, shape index: {}]   ;;  %s4183_s8 = inlined_call_operand.vmem [shape: f32[1,128], index: 8, kind: input, shape index: {}]   ;;  %s4184_s9 = inlined_call_operand.hbm [shape: bf16[128,256], index: 9, kind: input, shape index: {}]   ;;  %s4185_s10 = inlined_call_operand.hbm [shape: bf16[128,256], index: 10, kind: input, shape index: {}]   ;;  %s4186_s11 = inlined_call_operand.vmem [shape: f32[1,256], index: 11, kind: input, shape index: {}]   ;;  %s4187_s12 = inlined_call_operand.hbm [shape: bf16[128,256], index: 12, kind: input, shape index: {}]   ;;  %s4188_s13 = inlined_call_operand.vmem [shape: f32[1,256], index: 13, kind: input, shape index: {}]   ;;  %s4189_s14 = inlined_call_operand.hbm [shape: f32[2,16,128], index: 14, kind: output, shape index: {0}]   ;;  %s4190_s15 = inlined_call_operand.hbm [shape: f32[2,16,128], index: 15, kind: output, shape index: {1}]  }
   0x1   :  { %4224 = sst [smem:[#allocation43_spill]] %s4176_s1 }
   0x2   :  { %4225 = sst [smem:[#allocation44_spill]] %s4178_s3 }
   0x3   :  { %4226 = sst [smem:[#allocation45_spill]] %s4179_s4 }
   0x4   :  { %4227 = sst [smem:[#allocation46_spill]] %s4181_s6 }
   0x5   :  { %4228 = sst [smem:[#allocation47_spill]] %s4182_s7 }
   0x6   :  { %4229 = sst [smem:[#allocation48_spill]] %s4183_s8 }
   0x7   :  { %4230 = sst [smem:[#allocation49_spill]] %s4185_s10 }
   0x8   :  { %4231 = sst [smem:[#allocation50_spill]] %s4186_s11 }
   0x9   :  { %4232 = sst [smem:[#allocation51_spill]] %s4188_s13 }
   0xa   :  { %4233 = sst [smem:[#allocation52_spill]] %s4189_s14 }
   0xb   :  { %4234 = sst [smem:[#allocation53_spill]] %s4190_s15 }
   0xc   :  { %21 = vsyncpa [#allocation7], 0 }
   0xd   :  { %23 = vsyncpa [#allocation7 + $0x1], 0 }
   0xe   :  { %24 = vsyncpa [#allocation10], 0 }
   0xf   :  { %26 = vsyncpa [#allocation10 + $0x1], 0 }
  0x10   :  { %27 = vsyncpa [#allocation13], 0 }
  0x11   :  { %28 = vsyncpa [#allocation16], 0 }
  0x12   :  { %29 = vsyncpa [#allocation19], 0 }
  0x13   :  { %30 = vsyncpa [#allocation8], 0 }
  0x14   :  { %32 = vsyncpa [#allocation8 + $0x1], 0 }
  0x15   :  { %33 = vsyncpa [#allocation23], 0 }
  0x16   :  { %35 = vsyncpa [#allocation23 + $0x1], 0  ;;  %s3544_s18 = smov 0   ;;  %s3546_s19 = smov 0  }
  0x17   :  { %s3548_s20 = smov 0   ;;  %s3550_s21 = smov 0  }
  0x18   :  { %s3552_s22 = smov 0   ;;  %s3554_s23 = smov 0  }
  0x19 LB: > { %4235 = sst [smem:[#allocation31_spill]] %s3419_s18  ;;  %s3575_s24 = sadd.s32 4294967295, %s3439_s23   ;;  %s3439_s23 = sphi %s3554_s23, %s41_s23   ;;  %s3435_s22 = sphi %s3552_s22, %s4299_s22   ;;  %s3431_s21 = sphi %s3550_s21, %s4302_s21   ;;  %s3427_s20 = sphi %s3548_s20, %s4301_s20   ;;  %s3423_s19 = sphi %s3546_s19, %s4300_s19   ;;  %s3419_s18 = sphi %s3544_s18, %s4296_s18  }
  0x1a   : > { %4236 = sst [smem:[#allocation32_spill]] %s3423_s19  ;;  %p2484_p0 = scmp.ge.s32.totalorder %s3439_s23, 1 }
  0x1b   : > { %4237 = sst [smem:[#allocation33_spill]] %s3431_s21  ;;  %p4197_p1 = scmp.eq.s32.totalorder %s3575_s24, 0 }
  0x1c   : > { %4238 = sst [smem:[#allocation34_spill]] %s3435_s22  ;;  %p436_p2 = scmp.lt.s32.totalorder %s3439_s23, 3 }
  0x1d   : > { %4239 = sst [smem:[#allocation35_spill]] %s3439_s23  ;;  %s3441_s26 = smov [#allocation12]  }
  0x1e   : > { %4240 = sst [smem:[#allocation36_spill]] %s3575_s24  ;;  %p3580_p3 = pnand %p2484_p0, %p436_p2 }
  0x1f   : > { %s448_s27 = sshll.u32 %s3441_s26, 4  ;;  %s3442_s29 = smov [#allocation15]   ;;  %s3584_s27 = int_to_ptr.vmem [resolvable:$true] %s448_s27 }
  0x20   : > { %s4241_s25 = scalar_select %p3580_p3, 1, 0 }
  0x21   : > { %p2735_p4 = pneg %p3580_p3  ;;  %s480_s30 = sshll.u32 %s3442_s29, 4  ;;  %s3595_s30 = int_to_ptr.vmem [resolvable:$true] %s480_s30 }
  0x22   : > { %4242 = sst [smem:[#allocation37_spill]] %s4241_s25  ;;  %s4244_s3 = sld [smem:[#allocation44_spill]] }
  0x23   : > { %p3591_p6 = pnand %p2735_p4, %p4197_p1 }
  0x25   : > { %s4243_s28 = scalar_select %p3591_p6, 1, 0 }
  0x26   : > { %p3605_p8 = pneg %p3591_p6 }
  0x28   : > { %s3051_s14 = scalar_lea.hbm %s4244_s3, 2048 }
  0x29   : > { %p3052_p7 = scmp.ne.s32.totalorder %s4244_s3, %s3051_s14  ;;  %p3058_p11 = scmp.lt.u32.totalorder %s3051_s14, %s4244_s3 }
  0x2a   : > { %s4245_s13 = scalar_select %p3605_p8, 1, 0 }
  0x2b   : > { %p3054_p9 = pnand %p3605_p8, %p3052_p7 }
  0x2d   : > { %p3055_p10 = pneg %p3054_p9 }
  0x2f   : > { %p3060_p12 = pnand %p3058_p11, %p3055_p10 }
  0x31   : > { %3063 = shalt.err (!%p3060_p12)
}
  0x32   : > { %s3064_s15 = scalar_lea.vmem %s3584_s27, 2048  ;;  %p3072_p4 = scmp.lt.s32.totalorder %s3584_s27, %s3584_s27 }
  0x33   : > { %p3065_p13 = scmp.ne.s32.totalorder %s3584_s27, %s3064_s15  ;;  %p3073_p5 = scmp.lt.s32.totalorder %s3064_s15, %s3064_s15 }
  0x35   : > { %p3067_p0 = pnand %p3065_p13, %p3605_p8  ;;  %p3074_p7 = por %p3073_p5, %p3072_p4 }
  0x37   : > { %p3068_p2 = pneg %p3067_p0 }
  0x39   : > { %p3075_p9 = pnand %p3074_p7, %p3068_p2 }
  0x3b   : > { %3078 = shalt.err (!%p3075_p9)
}
  0x3c   : > { %s4193_s16 = smov 128   ;;  %s4195_s14 = smov 8  }
  0x3d   : > { %2738 = dma.hbm_to_vmem [thread:$0]  (!%p3591_p6), %s4244_s3, 2048, %s3584_s27, [#allocation13], %s4193_s16, %s4193_s16, %s4195_s14  }
  0x3e   : > { %s4246_s7 = sld [smem:[#allocation47_spill]] }
  0x44   : > { %s3079_s15 = scalar_lea.hbm %s4246_s7, 2048 }
  0x45   : > { %p3080_p5 = scmp.ne.s32.totalorder %s4246_s7, %s3079_s15  ;;  %p3086_p12 = scmp.lt.u32.totalorder %s3079_s15, %s4246_s7 }
  0x47   : > { %p3082_p10 = pnand %p3080_p5, %p3605_p8 }
  0x49   : > { %p3083_p11 = pneg %p3082_p10 }
  0x4b   : > { %p3088_p13 = pnand %p3086_p12, %p3083_p11 }
  0x4d   : > { %3091 = shalt.err (!%p3088_p13)
}
  0x4e   : > { %s3092_s27 = scalar_lea.vmem %s3595_s30, 2048  ;;  %p3100_p7 = scmp.lt.s32.totalorder %s3595_s30, %s3595_s30 }
  0x4f   : > { %p3093_p0 = scmp.ne.s32.totalorder %s3595_s30, %s3092_s27  ;;  %p3101_p9 = scmp.lt.s32.totalorder %s3092_s27, %s3092_s27 }
  0x51   : > { %p3095_p2 = pnand %p3093_p0, %p3605_p8  ;;  %p3102_p5 = por %p3101_p9, %p3100_p7 }
  0x53   : > { %p3096_p4 = pneg %p3095_p2 }
  0x55   : > { %p3103_p10 = pnand %p3102_p5, %p3096_p4 }
  0x57   : > { %3106 = shalt.err (!%p3103_p10)
}
  0x58   : > { %s3445_s8 = smov 64   ;;  %s3446_s4 = smov 4  }
  0x59   : > { %2744 = dma.hbm_to_vmem [thread:$0]  (!%p3591_p6), %s4246_s7, 2048, %s3595_s30, [#allocation16], %s3445_s8, %s3445_s8, %s3446_s4  }
  0x5a   : > { %s3447_s21 = smov [#allocation18]   ;;  %s4247_s10 = sld [smem:[#allocation49_spill]] }
  0x5b   : > { %s509_s17 = sshll.u32 %s3447_s21, 4  ;;  %s510_s17 = int_to_ptr.vmem [resolvable:$true] %s509_s17 }
  0x60   : > { %s3107_s15 = scalar_lea.hbm %s4247_s10, 2048 }
  0x61   : > { %p3108_p11 = scmp.ne.s32.totalorder %s4247_s10, %s3107_s15  ;;  %p3114_p0 = scmp.lt.u32.totalorder %s3107_s15, %s4247_s10 }
  0x63   : > { %p3110_p12 = pnand %p3108_p11, %p3605_p8 }
  0x65   : > { %p3111_p13 = pneg %p3110_p12 }
  0x67   : > { %p3116_p2 = pnand %p3114_p0, %p3111_p13 }
  0x69   : > { %3119 = shalt.err (!%p3116_p2)
}
  0x6a   : > { %s3120_s30 = scalar_lea.vmem %s510_s17, 2048  ;;  %p3128_p5 = scmp.lt.s32.totalorder %s510_s17, %s510_s17 }
  0x6b   : > { %p3121_p4 = scmp.ne.s32.totalorder %s510_s17, %s3120_s30  ;;  %p3129_p10 = scmp.lt.s32.totalorder %s3120_s30, %s3120_s30 }
  0x6d   : > { %p3123_p7 = pnand %p3121_p4, %p3605_p8  ;;  %p3130_p1 = por %p3129_p10, %p3128_p5 }
  0x6f   : > { %p3124_p9 = pneg %p3123_p7 }
  0x71   : > { %p3131_p3 = pnand %p3130_p1, %p3124_p9 }
  0x73   : > { %3134 = shalt.err (!%p3131_p3)
}
  0x74   : > { %s4248_s16 = smov 8   ;;  %s4249_s8 = smov 128  }
  0x75   : > { %2750 = dma.hbm_to_vmem [thread:$0]  (!%p3591_p6), %s4247_s10, 2048, %s510_s17, [#allocation19], %s4249_s8, %s4249_s8, %s4248_s16  }
  0x76   : > { %s2483_s4 = sadd.s32 4294967294, %s3439_s23   ;;  %s60_s6 = sadd.s32 1, %s3435_s22 }
  0x77   : > { %s69_s11 = sadd.s32 1, %s3427_s20  ;;  %p62_p1 = scmp.ge.s32.totalorder %s60_s6, 2 }
  0x78   : > { %p76_p3 = scmp.ne.s32.totalorder %s3427_s20, %s3423_s19  ;;  %p77_p11 = scmp.eq.s32.totalorder %s3439_s23, 0 }
  0x79   : > { %p82_p12 = scmp.ne.s32.totalorder %s3423_s19, %s3419_s18  ;;  %s4304_s6 = smov (%p62_p1, %s60_s6), 0 }
  0x7a   : > { %4250 = sst [smem:[#allocation38_spill]] %s4304_s6  ;;  %p3683_p13 = por %p77_p11, %p76_p3 }
  0x7b   : > { %p4252_p0 = scmp.eq.s32.totalorder %s3575_s24, 0  ;;  %s64_s26 = ssub.s32 %s3435_s22, %s4304_s6 }
  0x7c   : > { %p395_p4 = scmp.eq.s32.totalorder %s3575_s24, 1  ;;  %p67_p7 = scmp.eq.s32.totalorder %s64_s26, 0 }
  0x7d   : > { %p3689_p2 = por %p4252_p0, %p82_p12  ;;  %p401_p9 = scmp.eq.s32.totalorder %s2483_s4, 1 }
  0x7e   : > { %p3696_p5 = por %p395_p4, %p76_p3  ;;  %p2777_p10 = scmp.lt.s32.totalorder %s3439_s23, 2 }
  0x7f   : > { %s4253_s17 = scalar_select %p3689_p2, 1, 0 }
  0x80   : > { %s4255_s29 = scalar_select %p3696_p5, 1, 0 }
  0x81   : > { %4254 = sst [smem:[#allocation39_spill]] %s4253_s17  ;;  %p3704_p1 = por %p401_p9, %p82_p12 }
  0x82   : > { %4256 = sst [smem:[#allocation40_spill]] %s4255_s29  ;;  %s4199_s30 = sand.u32 1, %s3427_s20  }
  0x83   : > { %s3702_s15 = scalar_select %p67_p7, %s3427_s20, %s69_s11  }
  0x84   : > { %s4258_s27 = scalar_select %p3704_p1, 1, 0 }
  0x85   : > { %4257 = sst [smem:[#allocation41_spill]] %s3702_s15  ;;  %s3711_s3 = sshll.u32 %s4199_s30, 4 }
  0x86   : > { %4259 = sst [smem:[#allocation42_spill]] %s4258_s27  ;;  %s3714_s14 = sshll.u32 %s3435_s22, 8 }
  0x87   : > { %p3718_p3 = pnand %p2777_p10, %p3683_p13  ;;  %s565_s11 = sand.u32 1, %s3439_s23  }
  0x88   : > { %s4261_s1 = sld [smem:[#allocation43_spill]]  ;;  %s569_s30 = scalar_lea.vmem [#allocation9], %s3711_s3 }
  0x89   : > { %s4260_s4 = scalar_select %p3718_p3, 1, 0 }
  0x8a   : > { %s578_s6 = sshll.u32 %s569_s30, 4  ;;  %s3448_s21 = smov [#allocation14]   ;;  %s3730_s6 = int_to_ptr.vmem [resolvable:$true] %s578_s6 }
  0x8b   : > { %s3732_s22 = sshll.u32 %s3448_s21, 4  ;;  %s3734_s15 = scalar_lea.sflag [#allocation10], %s565_s11  ;;  %s465_s22 = int_to_ptr.vmem [resolvable:$true] %s3732_s22 }
  0x8c   : > { %p3740_p12 = pneg %p3718_p3 }
  0x8e   : > { %s3727_s10 = scalar_lea.hbm %s4261_s1, %s3714_s14  ;;  %s3140_s23 = scalar_lea.hbm %s4261_s1, 512 }
  0x8f   : > { %s3135_s27 = scalar_lea.hbm %s3727_s10, 256  ;;  %p3141_p4 = scmp.lt.u32.totalorder %s3727_s10, %s4261_s1 }
  0x90   : > { %p3136_p11 = scmp.ne.s32.totalorder %s3727_s10, %s3135_s27  ;;  %p3142_p7 = scmp.lt.u32.totalorder %s3140_s23, %s3135_s27 }
  0x91   : > { %s4262_s7 = scalar_select %p3740_p12, 1, 0 }
  0x92   : > { %p3138_p13 = pnand %p3740_p12, %p3136_p11  ;;  %p3143_p9 = por %p3142_p7, %p3141_p4 }
  0x93   : > { %p3144_p10 = scmp.lt.u32.totalorder %s3135_s27, %s3727_s10 }
  0x94   : > { %p3139_p0 = pneg %p3138_p13 }
  0x95   : > { %p3145_p1 = por %p3144_p10, %p3143_p9 }
  0x97   : > { %p3146_p5 = pnand %p3145_p1, %p3139_p0 }
  0x99   : > { %3149 = shalt.err (!%p3146_p5)
}
  0x9a   : > { %s3150_s11 = scalar_lea.vmem %s3730_s6, 256  ;;  %s3449_s26 = smov [#allocation9]  }
  0x9b   : > { %p3151_p11 = scmp.ne.s32.totalorder %s3730_s6, %s3150_s11  ;;  %s3155_s30 = sshll.u32 %s3449_s26, 4  ;;  %s3156_s30 = int_to_ptr.vmem [resolvable:$false] %s3155_s30 }
  0x9c   : > { %s3157_s18 = scalar_lea.vmem %s3156_s30, 512  ;;  %p3158_p6 = scmp.lt.s32.totalorder %s3730_s6, %s3156_s30 }
  0x9d   : > { %p3153_p13 = pnand %p3151_p11, %p3740_p12  ;;  %p3159_p8 = scmp.lt.s32.totalorder %s3157_s18, %s3150_s11 }
  0x9f   : > { %p3154_p2 = pneg %p3153_p13  ;;  %p3160_p4 = por %p3159_p8, %p3158_p6 }
  0xa1   : > { %p3161_p7 = pnand %p3160_p4, %p3154_p2 }
  0xa3   : > { %3164 = shalt.err (!%p3161_p7)
}
  0xa4   : > { %2760 = dma.hbm_to_vmem [thread:$0]  (!%p3718_p3), %s3727_s10, 256, %s3730_s6, %s3734_s15, %s4249_s8, %s4249_s8, %s4248_s16  }
  0xa5   : > { %s3165_s21 = scalar_lea.hbm %s4180_s5, 4096  ;;  %p4263_p8 = scmp.ne.s32.totalorder %s4245_s13, 0 }
  0xa6   : > { %p3166_p6 = scmp.ne.s32.totalorder %s4180_s5, %s3165_s21  ;;  %p3172_p1 = scmp.lt.u32.totalorder %s3165_s21, %s4180_s5 }
  0xa8   : > { %p3168_p2 = pnand %p3166_p6, %p4263_p8 }
  0xaa   : > { %p3169_p5 = pneg %p3168_p2 }
  0xac   : > { %p3174_p0 = pnand %p3172_p1, %p3169_p5 }
  0xae   : > { %3177 = shalt.err (!%p3174_p0)
}
  0xaf   : > { %s3178_s1 = scalar_lea.vmem %s465_s22, 4096  ;;  %p3186_p13 = scmp.lt.s32.totalorder %s465_s22, %s465_s22 }
  0xb0   : > { %p3179_p9 = scmp.ne.s32.totalorder %s465_s22, %s3178_s1  ;;  %p3187_p4 = scmp.lt.s32.totalorder %s3178_s1, %s3178_s1 }
  0xb2   : > { %p3181_p10 = pnand %p3179_p9, %p4263_p8  ;;  %p3188_p7 = por %p3187_p4, %p3186_p13 }
  0xb4   : > { %p3182_p11 = pneg %p3181_p10 }
  0xb6   : > { %p3189_p3 = pnand %p3188_p7, %p3182_p11 }
  0xb8   : > { %3192 = shalt.err (!%p3189_p3)
}
  0xb9   : > { %s3450_s10 = smov 256   ;;  %s3451_s6 = smov 16  }
  0xba   : > { %p4264_p6 = scmp.ne.s32.totalorder %s4243_s28, 0  ;;  %s3452_s21 = smov [#allocation17]  }
  0xbb   : > { %s496_s11 = sshll.u32 %s3452_s21, 4  ;;  %s3453_s26 = smov [#allocation20]   ;;  %s497_s11 = int_to_ptr.vmem [resolvable:$true] %s496_s11 }
  0xbc   : > { %2741 = dma.hbm_to_vmem [thread:$0]  (!%p4264_p6), %s4180_s5, 4096, %s465_s22, [#allocation13], %s3450_s10, %s3450_s10, %s3451_s6  }
  0xbd   : > { %s525_s30 = sshll.u32 %s3453_s26, 4  ;;  %s3193_s1 = scalar_lea.hbm %s4184_s9, 2048  ;;  %s526_s30 = int_to_ptr.vmem [resolvable:$true] %s525_s30 }
  0xbe   : > { %p3194_p3 = scmp.ne.s32.totalorder %s4184_s9, %s3193_s1  ;;  %p3200_p1 = scmp.lt.u32.totalorder %s3193_s1, %s4184_s9 }
  0xc0   : > { %p3196_p2 = pnand %p3194_p3, %p4263_p8 }
  0xc2   : > { %p3197_p5 = pneg %p3196_p2 }
  0xc4   : > { %p3202_p0 = pnand %p3200_p1, %p3197_p5 }
  0xc6   : > { %3205 = shalt.err (!%p3202_p0)
}
  0xc7   : > { %s3206_s22 = scalar_lea.vmem %s497_s11, 2048  ;;  %p3214_p13 = scmp.lt.s32.totalorder %s497_s11, %s497_s11 }
  0xc8   : > { %p3207_p9 = scmp.ne.s32.totalorder %s497_s11, %s3206_s22  ;;  %p3215_p4 = scmp.lt.s32.totalorder %s3206_s22, %s3206_s22 }
  0xca   : > { %p3209_p10 = pnand %p3207_p9, %p4263_p8  ;;  %p3216_p7 = por %p3215_p4, %p3214_p13 }
  0xcc   : > { %p3210_p11 = pneg %p3209_p10 }
  0xce   : > { %p3217_p12 = pnand %p3216_p7, %p3210_p11 }
  0xd0   : > { %3220 = shalt.err (!%p3217_p12)
}
  0xd1   : > { %2747 = dma.hbm_to_vmem [thread:$0]  (!%p4264_p6), %s4184_s9, 2048, %s497_s11, [#allocation16], %s4249_s8, %s4249_s8, %s4248_s16  }
  0xd2   : > { %s3221_s29 = scalar_lea.hbm %s4187_s12, 2048 }
  0xd3   : > { %p3222_p3 = scmp.ne.s32.totalorder %s4187_s12, %s3221_s29  ;;  %p3228_p5 = scmp.lt.u32.totalorder %s3221_s29, %s4187_s12 }
  0xd5   : > { %p3224_p12 = pnand %p3222_p3, %p4263_p8 }
  0xd7   : > { %p3225_p2 = pneg %p3224_p12 }
  0xd9   : > { %p3230_p1 = pnand %p3228_p5, %p3225_p2 }
  0xdb   : > { %3233 = shalt.err (!%p3230_p1)
}
  0xdc   : > { %s3234_s21 = scalar_lea.vmem %s526_s30, 2048  ;;  %p3242_p11 = scmp.lt.s32.totalorder %s526_s30, %s526_s30 }
  0xdd   : > { %p3235_p0 = scmp.ne.s32.totalorder %s526_s30, %s3234_s21  ;;  %p3243_p13 = scmp.lt.s32.totalorder %s3234_s21, %s3234_s21 }
  0xdf   : > { %p3237_p9 = pnand %p3235_p0, %p4263_p8  ;;  %p3244_p4 = por %p3243_p13, %p3242_p11 }
  0xe1   : > { %p3238_p10 = pneg %p3237_p9 }
  0xe3   : > { %p3245_p7 = pnand %p3244_p4, %p3238_p10 }
  0xe5   : > { %3248 = shalt.err (!%p3245_p7)
}
  0xe6   : > { %2753 = dma.hbm_to_vmem [thread:$0]  (!%p4264_p6), %s4187_s12, 2048, %s526_s30, [#allocation19], %s4249_s8, %s4249_s8, %s4248_s16  }
  0xe7   : > { %s3832_s1 = scalar_lea.hbm %s4175_s0, %s3714_s14  ;;  %s546_s28 = scalar_lea.vmem [#allocation6], %s3711_s3 }
  0xe8   : > { %s555_s22 = sshll.u32 %s546_s28, 4  ;;  %s3841_s25 = scalar_lea.hbm %s4177_s2, %s3714_s14  ;;  %s3835_s22 = int_to_ptr.vmem [resolvable:$true] %s555_s22 }
  0xe9   : > { %s4265_s17 = sand.u32 1, %s3427_s20   ;;  %s3249_s29 = scalar_lea.hbm %s3832_s1, 256 }
  0xea   : > { %s3845_s30 = scalar_lea.sflag [#allocation7], %s4265_s17  ;;  %p3250_p8 = scmp.ne.s32.totalorder %s3832_s1, %s3249_s29 }
  0xeb   : > { %p4266_p6 = scmp.ne.s32.totalorder %s4262_s7, 0  ;;  %s3254_s23 = scalar_lea.hbm %s4175_s0, 512 }
  0xec   : > { %p3255_p2 = scmp.lt.u32.totalorder %s3832_s1, %s4175_s0  ;;  %p3256_p5 = scmp.lt.u32.totalorder %s3254_s23, %s3249_s29 }
  0xed   : > { %p3252_p3 = pnand %p3250_p8, %p4266_p6  ;;  %p3258_p0 = scmp.lt.u32.totalorder %s3249_s29, %s3832_s1 }
  0xee   : > { %p3257_p1 = por %p3256_p5, %p3255_p2 }
  0xef   : > { %p3253_p12 = pneg %p3252_p3 }
  0xf0   : > { %p3259_p9 = por %p3258_p0, %p3257_p1 }
  0xf2   : > { %p3260_p10 = pnand %p3259_p9, %p3253_p12 }
  0xf4   : > { %3263 = shalt.err (!%p3260_p10)
}
  0xf5   : > { %s3264_s14 = scalar_lea.vmem %s3835_s22, 256  ;;  %s3454_s11 = smov [#allocation6]  }
  0xf6   : > { %p3265_p11 = scmp.ne.s32.totalorder %s3835_s22, %s3264_s14  ;;  %s3269_s26 = sshll.u32 %s3454_s11, 4  ;;  %s3270_s26 = int_to_ptr.vmem [resolvable:$false] %s3269_s26 }
  0xf7   : > { %s3271_s13 = scalar_lea.vmem %s3270_s26, 512  ;;  %p3272_p7 = scmp.lt.s32.totalorder %s3835_s22, %s3270_s26 }
  0xf8   : > { %p3267_p13 = pnand %p3265_p11, %p4266_p6  ;;  %p3273_p8 = scmp.lt.s32.totalorder %s3271_s13, %s3264_s14 }
  0xfa   : > { %p3268_p4 = pneg %p3267_p13  ;;  %p3274_p3 = por %p3273_p8, %p3272_p7 }
  0xfc   : > { %p3275_p2 = pnand %p3274_p3, %p3268_p4 }
  0xfe   : > { %3278 = shalt.err (!%p3275_p2)
}
  0xff   : > { %p4267_p12 = scmp.ne.s32.totalorder %s4260_s4, 0  ;;  %s592_s18 = scalar_lea.vmem [#allocation11], %s3711_s3 }
 0x100   : > { %s601_s28 = sshll.u32 %s592_s18, 4  ;;  %s3279_s19 = scalar_lea.hbm %s3841_s25, 256  ;;  %s3873_s28 = int_to_ptr.vmem [resolvable:$true] %s601_s28 }
 0x101   : > { %2757 = dma.hbm_to_vmem [thread:$0]  (!%p4267_p12), %s3832_s1, 256, %s3835_s22, %s3845_s30, %s4249_s8, %s4249_s8, %s4248_s16  }
 0x102   : > { %p3280_p5 = scmp.ne.s32.totalorder %s3841_s25, %s3279_s19  ;;  %s3284_s29 = scalar_lea.hbm %s4177_s2, 512 }
 0x103   : > { %p3285_p9 = scmp.lt.u32.totalorder %s3841_s25, %s4177_s2  ;;  %p3286_p10 = scmp.lt.u32.totalorder %s3284_s29, %s3279_s19 }
 0x104   : > { %p3282_p1 = pnand %p3280_p5, %p4266_p6  ;;  %p3288_p13 = scmp.lt.u32.totalorder %s3279_s19, %s3841_s25 }
 0x105   : > { %p3287_p11 = por %p3286_p10, %p3285_p9 }
 0x106   : > { %p3283_p0 = pneg %p3282_p1 }
 0x107   : > { %p3289_p4 = por %p3288_p13, %p3287_p11 }
 0x109   : > { %p3290_p7 = pnand %p3289_p4, %p3283_p0 }
 0x10b   : > { %3293 = shalt.err (!%p3290_p7)
}
 0x10c   : > { %s3294_s3 = scalar_lea.vmem %s3873_s28, 256  ;;  %s3455_s1 = smov [#allocation11]  }
 0x10d   : > { %p3295_p8 = scmp.ne.s32.totalorder %s3873_s28, %s3294_s3  ;;  %s3299_s22 = sshll.u32 %s3455_s1, 4  ;;  %s3300_s22 = int_to_ptr.vmem [resolvable:$false] %s3299_s22 }
 0x10e   : > { %s3301_s30 = scalar_lea.vmem %s3300_s22, 512  ;;  %p3302_p5 = scmp.lt.s32.totalorder %s3873_s28, %s3300_s22 }
 0x10f   : > { %p3297_p3 = pnand %p3295_p8, %p4266_p6  ;;  %p3303_p1 = scmp.lt.s32.totalorder %s3301_s30, %s3294_s3 }
 0x111   : > { %p3298_p2 = pneg %p3297_p3  ;;  %p3304_p9 = por %p3303_p1, %p3302_p5 }
 0x113   : > { %p3305_p10 = pnand %p3304_p9, %p3298_p2 }
 0x115   : > { %3308 = shalt.err (!%p3305_p10)
}
 0x116   : > { %2763 = dma.hbm_to_vmem [thread:$0]  (!%p4267_p12), %s3841_s25, 256, %s3873_s28, %s3734_s15, %s4249_s8, %s4249_s8, %s4248_s16  }
 0x117   : > { %s4268_s7 = sld [smem:[#allocation37_spill]] }
 0x11d   : > { %p4269_p6 = scmp.ne.s32.totalorder %s4268_s7, 0 }
 0x11e   : > { %s4270_s23 = sld [smem:[#allocation32_spill]] (!%p4269_p6)  ;;  %s4271_s27 = sld [smem:[#allocation39_spill]] (!%p4269_p6) }
 0x11f   : > { %613 = sbr.rel (%p4269_p6) target bundleno = 2112 (0x840), region = 76 }
 0x124   : > { %s3903_s21 = sand.u32 (!%p4269_p6), 1, %s4270_s23   ;;  %p4272_p0 = scmp.ne.s32.totalorder (!%p4269_p6), %s4271_s27, 0 }
 0x125   : > { %s3906_s14 = sshll.u32 (!%p4269_p6), %s3903_s21, 4  ;;  %s616_s4 = scalar_lea.sflag (!%p4269_p6), [#allocation7], %s3903_s21 }
 0x126   : > { %s3910_s11 = scalar_lea.vmem [#allocation6], %s3906_s14 }
 0x127   : > { %3390 = dma.done.wait (%p4272_p0), %s616_s4, 256  }
 0x128   : > { %3392 = vsyncadd (%p4272_p0), %s616_s4, 4294967040  ;;  %s4273_s16 = sld [smem:[#allocation36_spill]]  ;;  %s628_s25 = scalar_lea.vmem [#allocation9], %s3906_s14 }
 0x12e   : > { %s624_s8 = sand.u32 1, %s4273_s16  }
 0x12f   : > { %s625_s15 = scalar_lea.sflag [#allocation10], %s624_s8 }
 0x130   : > { %3394 = dma.done.wait (%p4272_p0), %s625_s15, 512  }
 0x131   : > { %3396 = vsyncadd (%p4272_p0), %s625_s15, 4294966784  ;;  %s637_s26 = scalar_lea.vmem [#allocation11], %s3906_s14  ;;  %p4274_p12 = scmp.eq.s32.totalorder %s4273_s16, 0 }
 0x133   : > { %3398 = dma.done.wait (%p4274_p12), [#allocation13], 6144   ;;  %p4275_p11 = pmov %p4274_p12 }
 0x135   : > { %3400 = vsyncadd (%p4275_p11), [#allocation13], 4294961152  ;;  %p4276_p13 = pmov %p4275_p11 }
 0x136   : > { %p4277_p4 = pmov %p4275_p11 }
 0x137   : > { %3402 = dma.done.wait (%p4276_p13), [#allocation16], 4096  }
 0x138   : > { %3404 = vsyncadd (%p4277_p4), [#allocation16], 4294963200  ;;  %p4278_p7 = pmov %p4277_p4 }
 0x139   : > { %p4279_p8 = pmov %p4277_p4 }
 0x13a   : > { %3406 = dma.done.wait (%p4278_p7), [#allocation19], 4096  }
 0x13b   : > { %3408 = vsyncadd (%p4279_p8), [#allocation19], 4294963200  ;;  %v3456_v0 = vmov 0   ;;  %v2853_v1 = vld [vmem:[#allocation14 + $0x4] ss:$16 sps:$4 sm:$0xff]   ;;  %v905_v32 = vld [vmem:[%s628_s25 + $0x8] sm:$0xff]  ;;  %v754_v40 = vlaneseq }
 0x13c   : > { %1153 = vmatprep.mubr.bf16.mxu1 %v3456_v0  ;;  %876 = vmatprep.mubr.bf16.mxu0 %v3456_v0  ;;  %v2855_v2 = vld [vmem:[#allocation14] ss:$16 sps:$4 sm:$0xff]   ;;  %v2856_v3 = vld [vmem:[#allocation14 + $0x24] ss:$16 sps:$4 sm:$0xff]   ;;  %v3947_v36 = vld [vmem:[%s3910_s11 + $0x8] sm:$0xff]  ;;  %v3457_v39 = vmov 0.0  }
 0x13d   : > { %2851 = vset.pattern.permute.xlu0 %v3456_v0  ;;  %2852 = vset.pattern.permute.xlu1 %v3456_v0  ;;  %v2858_v4 = vld [vmem:[#allocation12 + $0x4] ss:$8 sps:$4 sm:$0xff]   ;;  %v2860_v5 = vld [vmem:[#allocation14 + $0x20] ss:$16 sps:$4 sm:$0xff]   ;;  %v2864_v8 = vld [vmem:[#allocation12 + $0x14] ss:$8 sps:$4 sm:$0xff]  }
 0x13e   : > { %1121 = vmatprep.subr.bf16.mxu1 %v2853_v1  ;;  %v2861_v6 = vld [vmem:[#allocation12] ss:$8 sps:$4 sm:$0xff]   ;;  %v2862_v7 = vld [vmem:[#allocation14 + $0x44] ss:$16 sps:$4 sm:$0xff]   ;;  %844 = vmatprep.subr.bf16.mxu0 %v2858_v4  ;;  %v2867_v9 = vld [vmem:[#allocation12 + $0x10] ss:$8 sps:$4 sm:$0xff]  }
 0x13f   : > { %1122 = vmatpush1.bf16.msra.mxu1 %v2855_v2  ;;  %845 = vmatpush1.bf16.msra.mxu0 %v2861_v6  ;;  %v2866_v10 = vld [vmem:[#allocation14 + $0x40] ss:$16 sps:$4 sm:$0xff]   ;;  %v2868_v11 = vld [vmem:[#allocation14 + $0x64] ss:$16 sps:$4 sm:$0xff]   ;;  %vm3458_vm0 = vmmov 0   ;;  %v3958_v41 = vshrl.u32 %v754_v40, 7 }
 0x140   : > { %1123 = vmatprep.subr.bf16.mxu1 %v2856_v3  ;;  %846 = vmatprep.subr.bf16.mxu0 %v2864_v8  ;;  %v2870_v12 = vld [vmem:[#allocation12 + $0x24] ss:$8 sps:$4 sm:$0xff]   ;;  %v2873_v13 = vld [vmem:[#allocation12 + $0x20] ss:$8 sps:$4 sm:$0xff]   ;;  %v2876_v15 = vld [vmem:[#allocation12 + $0x34] ss:$8 sps:$4 sm:$0xff]  }
 0x141   : > { %v2872_v14 = vld [vmem:[#allocation14 + $0x60] ss:$16 sps:$4 sm:$0xff]   ;;  %v2874_v16 = vld [vmem:[#allocation14 + $0x84] ss:$16 sps:$4 sm:$0xff]   ;;  %v3961_v42 = vsub.s32 0, %v3958_v41  ;;  %s4280_s28 = sld [smem:[#allocation46_spill]] }
 0x142   : > { %v2878_v17 = vld [vmem:[#allocation14 + $0x80] ss:$16 sps:$4 sm:$0xff]   ;;  %v2882_v19 = vld [vmem:[#allocation12 + $0x44] ss:$8 sps:$4 sm:$0xff]   ;;  %v2888_v23 = vld [vmem:[#allocation12 + $0x54] ss:$8 sps:$4 sm:$0xff]  }
 0x143   : > { %1124 = vmatpush1.bf16.msra.mxu1 %v2860_v5  ;;  %847 = vmatpush1.bf16.msra.mxu0 %v2867_v9  ;;  %v2879_v18 = vld [vmem:[#allocation12 + $0x30] ss:$8 sps:$4 sm:$0xff]   ;;  %v2880_v20 = vld [vmem:[#allocation14 + $0xa4] ss:$16 sps:$4 sm:$0xff]   ;;  %v2885_v21 = vld [vmem:[#allocation12 + $0x40] ss:$8 sps:$4 sm:$0xff]  }
 0x144   : > { %1125 = vmatprep.subr.bf16.mxu1 %v2862_v7  ;;  %848 = vmatprep.subr.bf16.mxu0 %v2870_v12  ;;  %v2884_v22 = vld [vmem:[#allocation14 + $0xa0] ss:$16 sps:$4 sm:$0xff]   ;;  %v2886_v24 = vld [vmem:[#allocation14 + $0xc4] ss:$16 sps:$4 sm:$0xff]   ;;  %v3969_v44 = vsub.s32 1, %v3958_v41  ;;  %s4281_s17 = sld [smem:[#allocation45_spill]] }
 0x145   : > { %v2890_v25 = vld [vmem:[#allocation14 + $0xc0] ss:$16 sps:$4 sm:$0xff]   ;;  %v2892_v27 = vld [vmem:[#allocation14 + $0xe4] ss:$16 sps:$4 sm:$0xff]   ;;  %v2901_v7 = vld [vmem:[#allocation14 + $0x8] ss:$16 sps:$4 sm:$0xff]  }
 0x146   : > { %v2891_v26 = vld [vmem:[#allocation12 + $0x50] ss:$8 sps:$4 sm:$0xff]   ;;  %v2894_v28 = vld [vmem:[#allocation12 + $0x64] ss:$8 sps:$4 sm:$0xff]   ;;  %v2897_v29 = vld [vmem:[#allocation12 + $0x60] ss:$8 sps:$4 sm:$0xff]  }
 0x147   : > { %1126 = vmatpush1.bf16.msra.mxu1 %v2866_v10  ;;  %849 = vmatpush1.bf16.msra.mxu0 %v2873_v13  ;;  %v2896_v30 = vld [vmem:[#allocation14 + $0xe0] ss:$16 sps:$4 sm:$0xff]   ;;  %v2898_v33 = vld [vmem:[#allocation12 + $0x74] ss:$8 sps:$4 sm:$0xff]   ;;  %v2904_v10 = vld [vmem:[#allocation14 + $0x28] ss:$16 sps:$4 sm:$0xff]  }
 0x148   : > { %1127 = vmatprep.subr.bf16.mxu1 %v2868_v11  ;;  %850 = vmatprep.subr.bf16.mxu0 %v2876_v15  ;;  %v904_v31 = vld [vmem:[%s628_s25] sm:$0xff]  ;;  %v2903_v8 = vld [vmem:[#allocation14 + $0xc] ss:$16 sps:$4 sm:$0xff]   ;;  %vm891_vm1 = vcmask 7168   ;;  %v3459_v12 = vmov -inf   ;;  %vm1299_vm2 = vcmask 130048  }
 0x149   : > { %v2900_v34 = vld [vmem:[#allocation12 + $0x70] ss:$8 sps:$4 sm:$0xff]   ;;  %v3949_v37 = vpack.c.bf16 %v905_v32, %v904_v31  ;;  %v3966_v43 = vld [vmem:[%s4280_s28] sm:$0xf]  ;;  %v2906_v9 = vld [vmem:[#allocation14 + $0x2c] ss:$16 sps:$4 sm:$0xff]  }
 0x14a   : > { %v3944_v35 = vld [vmem:[%s3910_s11] sm:$0xff]  ;;  %v944_v46 = vrot.slane %v3966_v43, %v3961_v42  ;;  %v948_v48 = vrot.slane %v3966_v43, %v3969_v44  ;;  %v2909_v11 = vld [vmem:[#allocation14 + $0x4c] ss:$16 sps:$4 sm:$0xff]   ;;  %892 = vst.msk [vmem:[#allocation3] sm:$0xff] %vm891_vm1, %v3459_v12  ;;  %893 = vst.msk [vmem:[#allocation3 + $0x8] sm:$0xff] %vm891_vm1, %v3459_v12  ;;  %s4282_s6 = sld [smem:[#allocation48_spill]] }
 0x14b   : > { %1128 = vmatpush1.bf16.msra.mxu1 %v2872_v14  ;;  %851 = vmatpush1.bf16.msra.mxu0 %v2879_v18  ;;  %v735_v38 = vpack.c.bf16 %v3947_v36, %v3944_v35  ;;  %v752_v45 = vld [vmem:[%s4281_s17] sm:$0x3]  ;;  %894 = vst.msk [vmem:[#allocation3 + $0x10] sm:$0xff] %vm891_vm1, %v3459_v12  ;;  %895 = vst.msk [vmem:[#allocation3 + $0x18] sm:$0xff] %vm891_vm1, %v3459_v12  ;;  %v2907_v13 = vld [vmem:[#allocation14 + $0x48] ss:$16 sps:$4 sm:$0xff]  }
 0x14c   : > { %1129 = vmatprep.subr.bf16.mxu1 %v2874_v16  ;;  %852 = vmatprep.subr.bf16.mxu0 %v2882_v19  ;;  %v757_v49 = vrot.slane %v752_v45, %v3961_v42  ;;  %v761_v51 = vrot.slane %v752_v45, %v3969_v44  ;;  %896 = vst.msk [vmem:[#allocation4] sm:$0xff] %vm891_vm1, %v3457_v39  ;;  %897 = vst.msk [vmem:[#allocation4 + $0x8] sm:$0xff] %vm891_vm1, %v3457_v39  ;;  %v2912_v14 = vld [vmem:[#allocation14 + $0x6c] ss:$16 sps:$4 sm:$0xff]   ;;  %v2910_v15 = vld [vmem:[#allocation14 + $0x68] ss:$16 sps:$4 sm:$0xff]  }
 0x14d   : > { %898 = vst.msk [vmem:[#allocation4 + $0x10] sm:$0xff] %vm891_vm1, %v3457_v39  ;;  %899 = vst.msk [vmem:[#allocation4 + $0x18] sm:$0xff] %vm891_vm1, %v3457_v39  ;;  %v2915_v16 = vld [vmem:[#allocation14 + $0x8c] ss:$16 sps:$4 sm:$0xff]   ;;  %v2916_v19 = vld [vmem:[#allocation14 + $0xa8] ss:$16 sps:$4 sm:$0xff]  }
 0x14e   : > { %v2918_v18 = vld [vmem:[#allocation14 + $0xac] ss:$16 sps:$4 sm:$0xff]   ;;  %s4283_s22 = sld [smem:[#allocation50_spill]]  ;;  %s4284_s30 = sld [smem:[#allocation33_spill]] }
 0x14f   : > { %1130 = vmatpush1.bf16.msra.mxu1 %v2878_v17  ;;  %853 = vmatpush1.bf16.msra.mxu0 %v2885_v21  ;;  %v2913_v17 = vld [vmem:[#allocation14 + $0x88] ss:$16 sps:$4 sm:$0xff]   ;;  %s4285_s27 = sld [smem:[#allocation51_spill]]  ;;  %s722_s4 = scalar_lea.vmem [#allocation22], %s3906_s14 }
 0x150   : > { %1131 = vmatprep.subr.bf16.mxu1 %v2880_v20  ;;  %854 = vmatprep.subr.bf16.mxu0 %v2888_v23  ;;  %v2921_v20 = vld [vmem:[#allocation14 + $0xcc] ss:$16 sps:$4 sm:$0xff]   ;;  %v2919_v21 = vld [vmem:[#allocation14 + $0xc8] ss:$16 sps:$4 sm:$0xff]   ;;  %s2251_s16 = sshll.u32 %s722_s4, 4  ;;  %s4077_s15 = scalar_lea.vmem [#allocation21], %s3906_s14  ;;  %s4080_s16 = int_to_ptr.vmem [resolvable:$true] %s2251_s16 }
 0x151   : > { %v2922_v23 = vld [vmem:[#allocation14 + $0xe8] ss:$16 sps:$4 sm:$0xff]   ;;  %s2233_s25 = sshll.u32 %s4077_s15, 4  ;;  %s4287_s18 = sld [smem:[#allocation53_spill]]  ;;  %s4088_s25 = int_to_ptr.vmem [resolvable:$true] %s2233_s25 }
 0x152   : > { %s4289_s29 = sld [smem:[#allocation52_spill]]  ;;  %s3309_s3 = scalar_lea.vmem %s4080_s16, 256 }
 0x153   : > { %1132 = vmatpush1.bf16.msra.mxu1 %v2884_v22  ;;  %855 = vmatpush1.bf16.msra.mxu0 %v2891_v26  ;;  %v2924_v22 = vld [vmem:[#allocation14 + $0xec] ss:$16 sps:$4 sm:$0xff]   ;;  %p3310_p3 = scmp.ne.s32.totalorder %s4080_s16, %s3309_s3  ;;  %s3460_s1 = smov [#allocation22]  }
 0x154   : > { %1133 = vmatprep.subr.bf16.mxu1 %v2886_v24  ;;  %856 = vmatprep.subr.bf16.mxu0 %v2894_v28  ;;  %s2641_s8 = sshll.u32 %s4284_s30, 8 }
 0x157   : > { %1134 = vmatpush1.bf16.msra.mxu1 %v2890_v25  ;;  %857 = vmatpush1.bf16.msra.mxu0 %v2897_v29  ;;  %s4288_s28 = smov %s4287_s18  ;;  %s4086_s19 = scalar_lea.hbm %s4287_s18, %s2641_s8 }
 0x158   : > { %1135 = vmatprep.subr.bf16.mxu1 %v2892_v27  ;;  %858 = vmatprep.subr.bf16.mxu0 %v2898_v33  ;;  %s4094_s10 = scalar_lea.hbm %s4289_s29, %s2641_s8 }
 0x15b   : > { %1136 = vmatpush1.bf16.msra.mxu1 %v2896_v30  ;;  %859 = vmatpush1.bf16.msra.mxu0 %v2900_v34 }
 0x15c   : > { %2673 = vmatprep.subr.bf16.mxu1 %v3457_v39  ;;  %1164 = vmatprep.subr.bf16.mxu0 %v2903_v8 }
 0x15e   : > { %1154 = vmatmul.mubr.bf16.vlgmr.msra.gmra.mrb[0].mxu1 %v3949_v37  ;;  %877 = vmatmul.mubr.bf16.vlgmr.msra.gmra.mrb[0].mxu0 %v735_v38  ;;  %v4003_v38 = vld [vmem:[#allocation3] sm:$0xff] }
 0x15f   : > { %1196 = vmatprep.mubr.bf16.mxu0 %v3456_v0  ;;  %2675 = vmatprep.mubr.msk.bf16.mxu1 %vm3458_vm0, %v3457_v39 }
 0x160   : > { %1165 = vmatpush1.bf16.msra.mxu0 %v2901_v7 }
 0x161   : > { %1166 = vmatprep.subr.bf16.mxu0 %v2906_v9 }
 0x164   : > { %1167 = vmatpush1.bf16.msra.mxu0 %v2904_v10 }
 0x165   : > { %1168 = vmatprep.subr.bf16.mxu0 %v2909_v11 }
 0x168   : > { %1169 = vmatpush1.bf16.msra.mxu0 %v2907_v13 }
 0x169   : > { %1170 = vmatprep.subr.bf16.mxu0 %v2912_v14 }
 0x16c   : > { %1171 = vmatpush1.bf16.msra.mxu0 %v2910_v15 }
 0x16d   : > { %1172 = vmatprep.subr.bf16.mxu0 %v2915_v16 }
 0x170   : > { %1173 = vmatpush1.bf16.msra.mxu0 %v2913_v17 }
 0x171   : > { %1174 = vmatprep.subr.bf16.mxu0 %v2918_v18 }
 0x174   : > { %1175 = vmatpush1.bf16.msra.mxu0 %v2916_v19 }
 0x175   : > { %1176 = vmatprep.subr.bf16.mxu0 %v2921_v20 }
 0x178   : > { %1177 = vmatpush1.bf16.msra.mxu0 %v2919_v21 }
 0x179   : > { %1178 = vmatprep.subr.bf16.mxu0 %v2924_v22 }
 0x17c   : > { %1179 = vmatpush1.bf16.msra.mxu0 %v2922_v23 }
 0x17f   : > { %1197 = vmatmul.mubr.bf16.vlgmr.msra.gmra.mrb[4].mxu0 %v3949_v37 }
 0x231   : > { %v1155_v47 = vpop.f32.mrb[0].mxu1  ;;  %v878_v56 = vpop.f32.mrb[0].mxu0 }
 0x232   : > { %v1157_v50 = vpop.f32.mrb[1].mxu1  ;;  %v1156_v53 = vadd.f32 %v1155_v47, %v944_v46  ;;  %v879_v59 = vadd.f32 %v878_v56, %v757_v49  ;;  %v880_v60 = vpop.f32.mrb[1].mxu0 }
 0x233   : > { %v1159_v52 = vpop.f32.mrb[2].mxu1  ;;  %v1158_v57 = vadd.f32 %v1157_v50, %v948_v48  ;;  %v881_v62 = vadd.f32 %v880_v60, %v761_v51  ;;  %v882_v63 = vpop.f32.mrb[2].mxu0  ;;  %v4018_v50 = vld [vmem:[#allocation3 + $0x10] sm:$0xff] }
 0x234   : > { %v1160_v54 = vadd.f32 %v1159_v52, %v944_v46  ;;  %v1161_v55 = vpop.f32.mrb[3].mxu1  ;;  %v883_v2 = vadd.f32 %v882_v63, %v757_v49  ;;  %v884_v3 = vpop.f32.mrb[3].mxu0  ;;  %v4008_v46 = vld [vmem:[#allocation3 + $0x8] sm:$0xff] }
 0x235   : > { %v1162_v58 = vadd.f32 %v1161_v55, %v948_v48  ;;  %v885_v4 = vadd.f32 %v884_v3, %v761_v51  ;;  %v955_v3 = vsub.s32 3, %v3958_v41 }
 0x236   : > { %v1207_v61 = vpack.c.bf16 %v1160_v54, %v1156_v53  ;;  %v887_v5 = vpack.c.bf16 %v883_v2, %v879_v59  ;;  %v1298_v54 = vld [vmem:[#allocation3 + $0x18] sm:$0xff] }
 0x237   : > { %v1208_v1 = vpack.c.bf16 %v1162_v58, %v1158_v57  ;;  %v888_v6 = vpack.c.bf16 %v885_v4, %v881_v62  ;;  %v951_v58 = vsub.s32 2, %v3958_v41 }
 0x238   : > { %2674 = vmatpush3.bf16.xpose.msra.mxu1 %v1207_v61 }
 0x239   : > { %2679 = vmatprep.subr.bf16.mxu1 %v3457_v39  ;;  %v952_v61 = vrot.slane %v3966_v43, %v951_v58  ;;  %v1360_v58 = vld [vmem:[#allocation4] sm:$0xff] }
 0x23f   : > { %2676 = vmatmul.mubr.bf16.vlgmr.msra.gmra.mrb[4].mxu1 %v887_v5 }
 0x240   : > { %2680 = vmatpush3.bf16.xpose.msra.mxu1 %v1208_v1  ;;  %2681 = vmatprep.mubr.msk.bf16.mxu1 %vm3458_vm0, %v3457_v39 }
 0x241   : > { %2685 = vmatprep.subr.bf16.mxu1 %v3457_v39 }
 0x247   : > { %2682 = vmatmul.mubr.bf16.vlgmr.msra.gmra.mrb[8].mxu1 %v888_v6  ;;  %v956_v6 = vrot.slane %v3966_v43, %v955_v3 }
 0x248   : > { %2687 = vmatprep.mubr.msk.bf16.mxu1 %vm3458_vm0, %v3457_v39 }
 0x252   : > { %v1198_v59 = vpop.f32.mrb[4].mxu0 }
 0x253   : > { %v1200_v62 = vpop.f32.mrb[5].mxu0  ;;  %v1199_v1 = vadd.f32 %v1198_v59, %v952_v61 }
 0x254   : > { %v1202_v63 = vpop.f32.mrb[6].mxu0  ;;  %v1201_v7 = vadd.f32 %v1200_v62, %v956_v6 }
 0x255   : > { %v1203_v2 = vadd.f32 %v1202_v63, %v952_v61  ;;  %v1204_v5 = vpop.f32.mrb[7].mxu0 }
 0x256   : > { %v1205_v8 = vadd.f32 %v1204_v5, %v956_v6 }
 0x257   : > { %v1209_v4 = vpack.c.bf16 %v1203_v2, %v1199_v1  ;;  %v1361_v1 = vld [vmem:[#allocation4 + $0x8] sm:$0xff] }
 0x258   : > { %v1210_v9 = vpack.c.bf16 %v1205_v8, %v1201_v7 }
 0x259   : > { %2686 = vmatpush3.bf16.msra.mxu1 %v1209_v4 }
 0x25a   : > { %2691 = vmatprep.subr.bf16.mxu1 %v3457_v39 }
 0x312   : > { %v1247_v24 = vpop.f32.mrb[4].mxu1 }
 0x313   : > { %v2677_v25 = vpop.f32.mrb[5].mxu1  ;;  %v1300_v26 = vsel %vm1299_vm2, %v1247_v24, -inf }
 0x314   : > { %1301 = vmax.xlane.f32.xlu0 %v1300_v26  ;;  %v1250_v27 = vpop.f32.mrb[6].mxu1 }
 0x315   : > { %v2678_v28 = vpop.f32.mrb[7].mxu1  ;;  %v1303_v29 = vsel %vm1299_vm2, %v1250_v27, -inf }
 0x318   : > { %1304 = vmax.xlane.f32.xlu0 %v1303_v29 }
 0x31a   : > { %v1288_v30 = vpop.f32.mrb[8].mxu1 }
 0x31b   : > { %v2683_v31 = vpop.f32.mrb[9].mxu1  ;;  %v1306_v32 = vsel %vm1299_vm2, %v1288_v30, -inf }
 0x31c   : > { %1307 = vmax.xlane.f32.xlu1 %v1306_v32  ;;  %v1291_v33 = vpop.f32.mrb[10].mxu1 }
 0x31d   : > { %v2684_v34 = vpop.f32.mrb[11].mxu1  ;;  %v1309_v37 = vsel %vm1299_vm2, %v1291_v33, -inf }
 0x320   : > { %1310 = vmax.xlane.f32.xlu1 %v1309_v37 }
 0x3a1   : > { %v1302_v40 = vpop.xlane.xlu0 %1301 }
 0x3a2   : > { %v4006_v45 = vmax.f32 %v4003_v38, %v1302_v40 }
 0x3a4   : > { %v1316_v47 = vsub.f32 %v4003_v38, %v4006_v45  ;;  %1515 = vst.msk [vmem:[#allocation3] sm:$0xff] %vm891_vm1, %v4006_v45  ;;  %1330 = vperm.xlu0 %2851, %v4006_v45   ;;  %v2927_v38 = vld [vmem:[#allocation15 + $0x48] sm:$0xff]  }
 0x3a5   : > { %v1305_v48 = vpop.xlane.xlu0 %1304  ;;  %v2928_v45 = vld [vmem:[#allocation15 + $0x8] sm:$0xff]  }
 0x3a6   : > { %v4016_v49 = vmax.f32 %v4008_v46, %v1305_v48  ;;  %v1320_v31 = vmul.f32 1.442695, %v1316_v47  ;;  %v2925_v48 = vld [vmem:[#allocation15 + $0x40] sm:$0xff]   ;;  %v2929_v47 = vld [vmem:[#allocation15 + $0x50] sm:$0xff]  }
 0x3a7   : > { %2651 = vmatprep.subr.bf16.mxu0 %v2925_v48 }
 0x3a8   : > { %v1317_v51 = vsub.f32 %v4008_v46, %v4016_v49  ;;  %1516 = vst.msk [vmem:[#allocation3 + $0x8] sm:$0xff] %vm891_vm1, %v4016_v49  ;;  %1335 = vperm.xlu1 %2852, %v4016_v49   ;;  %v2930_v46 = vld [vmem:[#allocation15 + $0x10] sm:$0xff]   ;;  %v2931_v49 = vld [vmem:[#allocation15 + $0x58] sm:$0xff]  }
 0x3a9   : > { %v1308_v52 = vpop.xlane.xlu1 %1307 }
 0x3aa   : > { %v1314_v53 = vmax.f32 %v4018_v50, %v1308_v52  ;;  %v1322_v32 = vmul.f32 1.442695, %v1317_v51  ;;  %v2932_v51 = vld [vmem:[#allocation15 + $0x18] sm:$0xff]   ;;  %v2933_v52 = vld [vmem:[#allocation15 + $0x60] sm:$0xff]  }
 0x3ac   : > { %v1318_v55 = vsub.f32 %v4018_v50, %v1314_v53  ;;  %1517 = vst.msk [vmem:[#allocation3 + $0x10] sm:$0xff] %vm891_vm1, %v1314_v53  ;;  %1340 = vperm.xlu1 %2852, %v1314_v53   ;;  %v2926_v50 = vld [vmem:[#allocation15] sm:$0xff]  }
 0x3ad   : > { %v1311_v56 = vpop.xlane.xlu1 %1310  ;;  %2652 = vmatpush3.bf16.msra.mxu0 %v2926_v50  ;;  %v2934_v53 = vld [vmem:[#allocation15 + $0x20] sm:$0xff]  }
 0x3ae   : > { %v1315_v57 = vmax.f32 %v1298_v54, %v1311_v56  ;;  %2653 = vmatprep.subr.bf16.mxu0 %v2927_v38  ;;  %v2965_v50 = vld [vmem:[#allocation17] ss:$8 sps:$4 sm:$0xff]   ;;  %v2970_v38 = vld [vmem:[#allocation17 + $0x14] ss:$8 sps:$4 sm:$0xff]  }
 0x3b0   : > { %v1319_v60 = vsub.f32 %v1298_v54, %v1315_v57  ;;  %1518 = vst.msk [vmem:[#allocation3 + $0x18] sm:$0xff] %vm891_vm1, %v1315_v57  ;;  %1345 = vperm.xlu1 %2852, %v1315_v57   ;;  %v1362_v54 = vld [vmem:[#allocation4 + $0x10] sm:$0xff]  ;;  %v1363_v57 = vld [vmem:[#allocation4 + $0x18] sm:$0xff] }
 0x3b1   : > { %2654 = vmatpush3.bf16.msra.mxu0 %v2928_v45 }
 0x3b2   : > { %2655 = vmatprep.subr.bf16.mxu0 %v2929_v47 }
 0x3b5   : > { %2656 = vmatpush3.bf16.msra.mxu0 %v2930_v46 }
 0x3b6   : > { %2657 = vmatprep.subr.bf16.mxu0 %v2931_v49  ;;  %v2968_v49 = vld [vmem:[#allocation17 + $0x10] ss:$8 sps:$4 sm:$0xff]  }
 0x3b9   : > { %2658 = vmatpush3.bf16.msra.mxu0 %v2932_v51 }
 0x3ba   : > { %2659 = vmatprep.subr.bf16.mxu0 %v2933_v52  ;;  %v2973_v52 = vld [vmem:[#allocation17 + $0x24] ss:$8 sps:$4 sm:$0xff]  }
 0x3bd   : > { %2660 = vmatpush3.bf16.msra.mxu0 %v2934_v53  ;;  %v2971_v53 = vld [vmem:[#allocation17 + $0x20] ss:$8 sps:$4 sm:$0xff]  }
 0x423   : > { %v1331_v10 = vpop.permute.xlu0 %1330 }
 0x424   : > { %v1348_v11 = vsub.f32 %v1247_v24, %v1331_v10 }
 0x426   : > { %v1352_v12 = vmul.f32 1.442695, %v1348_v11 }
 0x427   : > { %v1336_v13 = vpop.permute.xlu1 %1335 }
 0x428   : > { %v1349_v14 = vsub.f32 %v1250_v27, %v1336_v13  ;;  %3013 = vpow2.f32 %v1352_v12  ;;  %v2935_v12 = vld [vmem:[#allocation15 + $0x68] sm:$0xff]  }
 0x429   : > { %v2936_v13 = vld [vmem:[#allocation15 + $0x28] sm:$0xff]   ;;  %2661 = vmatprep.subr.bf16.mxu0 %v2935_v12 }
 0x42a   : > { %v1354_v15 = vmul.f32 1.442695, %v1349_v14  ;;  %2662 = vmatpush3.bf16.msra.mxu0 %v2936_v13 }
 0x42b   : > { %v1341_v16 = vpop.permute.xlu1 %1340 }
 0x42c   : > { %3015 = vpow2.f32 %v1354_v15  ;;  %v1350_v41 = vsub.f32 %v1288_v30, %v1341_v16  ;;  %v1324_v30 = vmul.f32 1.442695, %v1318_v55  ;;  %v2937_v15 = vld [vmem:[#allocation15 + $0x70] sm:$0xff]  }
 0x42d   : > { %2663 = vmatprep.subr.bf16.mxu0 %v2937_v15 }
 0x42e   : > { %v1356_v17 = vmul.f32 1.442695, %v1350_v41  ;;  %v2938_v41 = vld [vmem:[#allocation15 + $0x30] sm:$0xff]  }
 0x42f   : > { %v1346_v18 = vpop.permute.xlu1 %1345  ;;  %2664 = vmatpush3.bf16.msra.mxu0 %v2938_v41 }
 0x430   : > { %3017 = vpow2.f32 %v1356_v17  ;;  %v1351_v43 = vsub.f32 %v1291_v33, %v1346_v18  ;;  %v2939_v18 = vld [vmem:[#allocation15 + $0x78] sm:$0xff]  }
 0x431   : > { %2665 = vmatprep.subr.bf16.mxu0 %v2939_v18 }
 0x432   : > { %v1358_v19 = vmul.f32 1.442695, %v1351_v43  ;;  %v3014_v20 = vpop.eup %3013  ;;  %v2940_v43 = vld [vmem:[#allocation15 + $0x38] sm:$0xff]  }
 0x433   : > { %v1368_v26 = vsel %vm1299_vm2, %v3014_v20, 0.0  ;;  %2666 = vmatpush3.bf16.msra.mxu0 %v2940_v43 }
 0x434   : > { %3019 = vpow2.f32 %v1358_v19  ;;  %v2941_v19 = vld [vmem:[#allocation18] ss:$8 sps:$4 sm:$0xff]  }
 0x435   : > { %3021 = vpow2.f32 %v1324_v30  ;;  %v2956_v30 = vld [vmem:[#allocation18 + $0x50] ss:$8 sps:$4 sm:$0xff]  }
 0x436   : > { %v3016_v21 = vpop.eup %3015 }
 0x437   : > { %v1417_v22 = vpack.c.bf16 %v3016_v21, %v3014_v20  ;;  %v1371_v29 = vsel %vm1299_vm2, %v3016_v21, 0.0  ;;  %v2943_v20 = vld [vmem:[#allocation18 + $0x4] ss:$8 sps:$4 sm:$0xff]   ;;  %v2946_v21 = vld [vmem:[#allocation18 + $0x14] ss:$8 sps:$4 sm:$0xff]  }
 0x439   : > { %2688 = vmatmul.mubr.msk.bf16.vlgmr.msra.gmra.mrb[12].mxu1 %vm1299_vm2, %v1417_v22  ;;  %v2944_v22 = vld [vmem:[#allocation18 + $0x10] ss:$8 sps:$4 sm:$0xff]  }
 0x43a   : > { %v3018_v23 = vpop.eup %3017  ;;  %2692 = vmatpush3.bf16.msra.mxu1 %v1210_v9  ;;  %2693 = vmatprep.mubr.msk.bf16.mxu1 %vm3458_vm0, %v3457_v39  ;;  %v1326_v39 = vmul.f32 1.442695, %v1319_v60 }
 0x43b   : > { %v1374_v24 = vsel %vm1299_vm2, %v3018_v23, 0.0  ;;  %1854 = vmatprep.subr.bf16.mxu1 %v2943_v20  ;;  %v2980_v20 = vld [vmem:[#allocation17 + $0x50] ss:$8 sps:$4 sm:$0xff]  }
 0x43c   : > { %1375 = vadd.xlane.f32.xlu1 %v1374_v24  ;;  %3023 = vpow2.f32 %v1326_v39  ;;  %v2947_v24 = vld [vmem:[#allocation18 + $0x20] ss:$8 sps:$4 sm:$0xff]   ;;  %v2961_v39 = vld [vmem:[#allocation18 + $0x64] ss:$8 sps:$4 sm:$0xff]  }
 0x43d   : > { %3025 = vpow2.f32 %v1320_v31  ;;  %v2959_v31 = vld [vmem:[#allocation18 + $0x60] ss:$8 sps:$4 sm:$0xff]  }
 0x43e   : > { %v3020_v25 = vpop.eup %3019  ;;  %3027 = vpow2.f32 %v1322_v32  ;;  %v2964_v32 = vld [vmem:[#allocation18 + $0x74] ss:$8 sps:$4 sm:$0xff]  }
 0x43f   : > { %v1377_v27 = vsel %vm1299_vm2, %v3020_v25, 0.0  ;;  %v1418_v28 = vpack.c.bf16 %v3020_v25, %v3018_v23  ;;  %v3022_v33 = vpop.eup %3021  ;;  %v2949_v23 = vld [vmem:[#allocation18 + $0x24] ss:$8 sps:$4 sm:$0xff]   ;;  %v2952_v25 = vld [vmem:[#allocation18 + $0x34] ss:$8 sps:$4 sm:$0xff]  }
 0x440   : > { %1369 = vadd.xlane.f32.xlu1 %v1368_v26  ;;  %1378 = vadd.xlane.f32.xlu0 %v1377_v27  ;;  %v1366_v55 = vmul.f32 %v3022_v33, %v1362_v54  ;;  %v2950_v26 = vld [vmem:[#allocation18 + $0x30] ss:$8 sps:$4 sm:$0xff]   ;;  %v2955_v27 = vld [vmem:[#allocation18 + $0x44] ss:$8 sps:$4 sm:$0xff]   ;;  %v2976_v54 = vld [vmem:[#allocation17 + $0x34] ss:$8 sps:$4 sm:$0xff]  }
 0x441   : > { %2694 = vmatmul.mubr.msk.bf16.vlgmr.msra.gmra.mrb[16].mxu1 %vm1299_vm2, %v1418_v28  ;;  %v2953_v28 = vld [vmem:[#allocation18 + $0x40] ss:$8 sps:$4 sm:$0xff]  }
 0x442   : > { %1886 = vmatprep.mubr.bf16.mxu1 %v3456_v0  ;;  %1855 = vmatpush1.bf16.msra.mxu1 %v2941_v19  ;;  %v2982_v19 = vld [vmem:[#allocation17 + $0x54] ss:$8 sps:$4 sm:$0xff]  }
 0x443   : > { %1856 = vmatprep.subr.bf16.mxu1 %v2946_v21  ;;  %v2985_v21 = vld [vmem:[#allocation17 + $0x64] ss:$8 sps:$4 sm:$0xff]  }
 0x444   : > { %1372 = vadd.xlane.f32.xlu1 %v1371_v29  ;;  %v2958_v29 = vld [vmem:[#allocation18 + $0x54] ss:$8 sps:$4 sm:$0xff]  }
 0x446   : > { %v3024_v34 = vpop.eup %3023  ;;  %1857 = vmatpush1.bf16.msra.mxu1 %v2944_v22  ;;  %v2983_v22 = vld [vmem:[#allocation17 + $0x60] ss:$8 sps:$4 sm:$0xff]  }
 0x447   : > { %v3026_v37 = vpop.eup %3025  ;;  %v1367_v60 = vmul.f32 %v3024_v34, %v1363_v57  ;;  %1858 = vmatprep.subr.bf16.mxu1 %v2949_v23  ;;  %v2988_v23 = vld [vmem:[#allocation17 + $0x74] ss:$8 sps:$4 sm:$0xff]  }
 0x448   : > { %v3028_v40 = vpop.eup %3027  ;;  %v1364_v61 = vmul.f32 %v3026_v37, %v1360_v58  ;;  %v2974_v58 = vld [vmem:[#allocation17 + $0x30] ss:$8 sps:$4 sm:$0xff]  }
 0x449   : > { %v1365_v4 = vmul.f32 %v3028_v40, %v1361_v1 }
 0x44a   : > { %1859 = vmatpush1.bf16.msra.mxu1 %v2947_v24  ;;  %v2986_v24 = vld [vmem:[#allocation17 + $0x70] ss:$8 sps:$4 sm:$0xff]  }
 0x44b   : > { %1860 = vmatprep.subr.bf16.mxu1 %v2952_v25 }
 0x44e   : > { %1861 = vmatpush1.bf16.msra.mxu1 %v2950_v26  ;;  %v2563_v26 = vld [vmem:[%s4282_s6] ss:$0 sm:$0xff]  ;;  %s2218_s6 = scalar_lea.sflag [#allocation23], %s3903_s21 }
 0x44f   : > { %1862 = vmatprep.subr.bf16.mxu1 %v2955_v27 }
 0x452   : > { %1863 = vmatpush1.bf16.msra.mxu1 %v2953_v28 }
 0x453   : > { %1864 = vmatprep.subr.bf16.mxu1 %v2958_v29 }
 0x455   : > { %1405 = vperm.xlu1 %2852, %v3022_v33   ;;  %v2962_v33 = vld [vmem:[#allocation18 + $0x70] ss:$8 sps:$4 sm:$0xff]  }
 0x456   : > { %1410 = vperm.xlu0 %2851, %v3024_v34   ;;  %1865 = vmatpush1.bf16.msra.mxu1 %v2956_v30  ;;  %v1755_v34 = vld [vmem:[%s637_s26] sm:$0xff] }
 0x457   : > { %1866 = vmatprep.subr.bf16.mxu1 %v2961_v39 }
 0x459   : > { %1395 = vperm.xlu1 %2852, %v3026_v37   ;;  %v1756_v37 = vld [vmem:[%s637_s26 + $0x8] sm:$0xff]  ;;  %s4286_s26 = sld [smem:[#allocation40_spill]] }
 0x45a   : > { %1867 = vmatpush1.bf16.msra.mxu1 %v2959_v31  ;;  %v1757_v48 = vpack.c.bf16 %v1756_v37, %v1755_v34  ;;  %v2991_v37 = vld [vmem:[#allocation20 + $0x4] ss:$8 sps:$4 sm:$0xff]  }
 0x45b   : > { %1868 = vmatprep.subr.bf16.mxu1 %v2964_v32  ;;  %2161 = vmatprep.subr.bf16.mxu0 %v2991_v37 }
 0x45d   : > { %1400 = vperm.xlu1 %2852, %v3028_v40   ;;  %v2967_v40 = vld [vmem:[#allocation17 + $0x4] ss:$8 sps:$4 sm:$0xff]  }
 0x45e   : > { %1869 = vmatpush1.bf16.msra.mxu1 %v2962_v33 }
 0x45f   : > { %1977 = vmatprep.subr.bf16.mxu1 %v2967_v40  ;;  %v2989_v40 = vld [vmem:[#allocation20] ss:$8 sps:$4 sm:$0xff]   ;;  %p4290_p2 = scmp.ne.s32.totalorder %s4286_s26, 0 }
 0x461   : > { %1887 = vmatmul.mubr.bf16.vlgmr.msra.gmra.mrb[20].mxu1 %v1757_v48  ;;  %v2994_v48 = vld [vmem:[#allocation20 + $0x14] ss:$8 sps:$4 sm:$0xff]   ;;  %p3311_p5 = pnand %p3310_p3, %p4290_p2 }
 0x462   : > { %1978 = vmatpush1.bf16.msra.mxu1 %v2965_v50  ;;  %2009 = vmatprep.mubr.bf16.mxu1 %v3456_v0  ;;  %v2992_v50 = vld [vmem:[#allocation20 + $0x10] ss:$8 sps:$4 sm:$0xff]  }
 0x463   : > { %1979 = vmatprep.subr.bf16.mxu1 %v2970_v38  ;;  %v2997_v38 = vld [vmem:[#allocation20 + $0x24] ss:$8 sps:$4 sm:$0xff]   ;;  %p3312_p1 = pneg %p3311_p5 }
 0x466   : > { %1980 = vmatpush1.bf16.msra.mxu1 %v2968_v49  ;;  %v3006_v49 = vld [vmem:[#allocation20 + $0x54] ss:$8 sps:$4 sm:$0xff]  }
 0x467   : > { %1981 = vmatprep.subr.bf16.mxu1 %v2973_v52  ;;  %v3009_v52 = vld [vmem:[#allocation20 + $0x64] ss:$8 sps:$4 sm:$0xff]  }
 0x46a   : > { %1982 = vmatpush1.bf16.msra.mxu1 %v2971_v53  ;;  %v3007_v53 = vld [vmem:[#allocation20 + $0x60] ss:$8 sps:$4 sm:$0xff]  }
 0x46b   : > { %1983 = vmatprep.subr.bf16.mxu1 %v2976_v54  ;;  %v3012_v54 = vld [vmem:[#allocation20 + $0x74] ss:$8 sps:$4 sm:$0xff]  }
 0x46e   : > { %1984 = vmatpush1.bf16.msra.mxu1 %v2974_v58 }
 0x4c9   : > { %v1376_v56 = vpop.xlane.xlu1 %1375 }
 0x4ca   : > { %v1382_v59 = vadd.f32 %v1376_v56, %v1366_v55 }
 0x4cc   : > { %1387 = vst.msk [vmem:[#allocation4 + $0x10] sm:$0xff] %vm891_vm1, %v1382_v59 }
 0x4cd   : > { %v1379_v62 = vpop.xlane.xlu0 %1378  ;;  %v1370_v63 = vpop.xlane.xlu1 %1369 }
 0x4ce   : > { %v1383_v2 = vadd.f32 %v1379_v62, %v1367_v60  ;;  %v1380_v3 = vadd.f32 %v1370_v63, %v1364_v61  ;;  %v2979_v60 = vld [vmem:[#allocation17 + $0x44] ss:$8 sps:$4 sm:$0xff]   ;;  %v2977_v61 = vld [vmem:[#allocation17 + $0x40] ss:$8 sps:$4 sm:$0xff]  }
 0x4cf   : > { %1985 = vmatprep.subr.bf16.mxu1 %v2979_v60 }
 0x4d0   : > { %1388 = vst.msk [vmem:[#allocation4 + $0x18] sm:$0xff] %vm891_vm1, %v1383_v2  ;;  %1385 = vst.msk [vmem:[#allocation4] sm:$0xff] %vm891_vm1, %v1380_v3  ;;  %1986 = vmatpush1.bf16.msra.mxu1 %v2977_v61 }
 0x4d1   : > { %v1373_v5 = vpop.xlane.xlu1 %1372  ;;  %1987 = vmatprep.subr.bf16.mxu1 %v2982_v19 }
 0x4d2   : > { %v1381_v6 = vadd.f32 %v1373_v5, %v1365_v4 }
 0x4d3   : > { %v1528_v7 = vld [vmem:[#allocation4 + $0x10] sm:$0xff] }
 0x4d4   : > { %1386 = vst.msk [vmem:[#allocation4 + $0x8] sm:$0xff] %vm891_vm1, %v1381_v6  ;;  %3029 = vrcp.f32 %v1528_v7  ;;  %1988 = vmatpush1.bf16.msra.mxu1 %v2980_v20 }
 0x4d5   : > { %v1406_v62 = vpop.permute.xlu1 %1405  ;;  %v1411_v2 = vpop.permute.xlu0 %1410  ;;  %1989 = vmatprep.subr.bf16.mxu1 %v2985_v21 }
 0x4d6   : > { %v1416_v4 = vmul.f32 0.0, %v1411_v2  ;;  %v1415_v5 = vmul.f32 0.0, %v1406_v62 }
 0x4d7   : > { %v1529_v8 = vld [vmem:[#allocation4 + $0x18] sm:$0xff]  ;;  %v1526_v9 = vld [vmem:[#allocation4] sm:$0xff] }
 0x4d8   : > { %3031 = vrcp.f32 %v1529_v8  ;;  %1990 = vmatpush1.bf16.msra.mxu1 %v2983_v22 }
 0x4d9   : > { %3033 = vrcp.f32 %v1526_v9  ;;  %v1396_v63 = vpop.permute.xlu1 %1395  ;;  %1991 = vmatprep.subr.bf16.mxu1 %v2988_v23 }
 0x4da   : > { %v1413_v9 = vmul.f32 0.0, %v1396_v63 }
 0x4db   : > { %v1527_v10 = vld [vmem:[#allocation4 + $0x8] sm:$0xff] }
 0x4dc   : > { %3035 = vrcp.f32 %v1527_v10  ;;  %1992 = vmatpush1.bf16.msra.mxu1 %v2986_v24 }
 0x4dd   : > { %v1401_v1 = vpop.permute.xlu1 %1400 }
 0x4de   : > { %v3030_v11 = vpop.eup %3029  ;;  %v1414_v10 = vmul.f32 0.0, %v1401_v1 }
 0x4df   : > { %1546 = vperm.xlu1 %2852, %v3030_v11  }
 0x4e2   : > { %v3032_v14 = vpop.eup %3031 }
 0x4e3   : > { %v3034_v16 = vpop.eup %3033  ;;  %1551 = vperm.xlu0 %2851, %v3032_v14  }
 0x4e4   : > { %1536 = vperm.xlu1 %2852, %v3034_v16  }
 0x4e6   : > { %v3036_v17 = vpop.eup %3035 }
 0x4e7   : > { %1541 = vperm.xlu0 %2851, %v3036_v17  }
 0x50c   : > { %v1456_v45 = vpop.f32.mrb[12].mxu1 }
 0x50d   : > { %v2689_v47 = vpop.f32.mrb[13].mxu1  ;;  %v1507_v14 = vadd.f32 %v1456_v45, %v1413_v9  ;;  %v2995_v45 = vld [vmem:[#allocation20 + $0x20] ss:$8 sps:$4 sm:$0xff]  }
 0x50e   : > { %v1459_v46 = vpop.f32.mrb[14].mxu1  ;;  %v3000_v47 = vld [vmem:[#allocation20 + $0x34] ss:$8 sps:$4 sm:$0xff]  }
 0x50f   : > { %v2690_v51 = vpop.f32.mrb[15].mxu1  ;;  %v1508_v15 = vadd.f32 %v1459_v46, %v1414_v10  ;;  %v2998_v46 = vld [vmem:[#allocation20 + $0x30] ss:$8 sps:$4 sm:$0xff]  }
 0x510   : > { %v3004_v51 = vld [vmem:[#allocation20 + $0x50] ss:$8 sps:$4 sm:$0xff]  }
 0x514   : > { %v1500_v55 = vpop.f32.mrb[16].mxu1 }
 0x515   : > { %v2695_v56 = vpop.f32.mrb[17].mxu1  ;;  %v1509_v6 = vadd.f32 %v1500_v55, %v1415_v5  ;;  %v3010_v55 = vld [vmem:[#allocation20 + $0x70] ss:$8 sps:$4 sm:$0xff]  }
 0x516   : > { %v1503_v57 = vpop.f32.mrb[18].mxu1  ;;  %v2020_v56 = vld [vmem:[%s4283_s22] sm:$0x3]  ;;  %s3313_s22 = sshll.u32 %s3460_s1, 4  ;;  %s3314_s22 = int_to_ptr.vmem [resolvable:$false] %s3313_s22 }
 0x517   : > { %v2696_v59 = vpop.f32.mrb[19].mxu1  ;;  %v1510_v7 = vadd.f32 %v1503_v57, %v1416_v4  ;;  %v2025_v57 = vrot.slane %v2020_v56, %v3961_v42  ;;  %s3315_s30 = scalar_lea.vmem %s3314_s22, 512  ;;  %p3316_p9 = scmp.lt.s32.totalorder %s4080_s16, %s3314_s22 }
 0x518   : > { %p3317_p10 = scmp.lt.s32.totalorder %s3315_s30, %s3309_s3 }
 0x51a   : > { %p3318_p6 = por %p3317_p10, %p3316_p9 }
 0x51c   : > { %p3319_p0 = pnand %p3318_p6, %p3312_p1 }
 0x55e   : > { %v1547_v3 = vpop.permute.xlu1 %1546 }
 0x55f   : > { %v1556_v11 = vmul.f32 %v1547_v3, %v1509_v6  ;;  %v2029_v3 = vrot.slane %v2020_v56, %v3969_v44 }
 0x562   : > { %v1552_v8 = vpop.permute.xlu0 %1551 }
 0x563   : > { %v1557_v12 = vmul.f32 %v1552_v8, %v1510_v7  ;;  %v1537_v13 = vpop.permute.xlu1 %1536 }
 0x564   : > { %v1554_v17 = vmul.f32 %v1537_v13, %v1507_v14 }
 0x565   : > { %v1559_v16 = vpack.c.bf16 %v1557_v12, %v1556_v11 }
 0x566   : > { %v1542_v41 = vpop.permute.xlu0 %1541 }
 0x567   : > { %v1555_v18 = vmul.f32 %v1542_v41, %v1508_v15  ;;  %1727 = vmatprep.mubr.bf16.mxu0 %v1559_v16  ;;  %v2069_v41 = vld [vmem:[%s4285_s27] sm:$0x3] }
 0x569   : > { %v1558_v43 = vpack.c.bf16 %v1555_v18, %v1554_v17  ;;  %v2074_v17 = vrot.slane %v2069_v41, %v3961_v42  ;;  %v2078_v18 = vrot.slane %v2069_v41, %v3969_v44  ;;  %v3049_v42 = vld [vmem:[%s3910_s11] sm:$0xff] }
 0x56b   : > { %1728 = vmatmul.mubr.bf16.vlgmr.msra.gmra.mrb[8].mxu0 %v1558_v43 }
 0x56c   : > { %2193 = vmatprep.mubr.bf16.mxu0 %v3456_v0  ;;  %2162 = vmatpush1.bf16.msra.mxu0 %v2989_v40 }
 0x56d   : > { %2163 = vmatprep.subr.bf16.mxu0 %v2994_v48 }
 0x570   : > { %2164 = vmatpush1.bf16.msra.mxu0 %v2992_v50 }
 0x571   : > { %2165 = vmatprep.subr.bf16.mxu0 %v2997_v38 }
 0x574   : > { %2166 = vmatpush1.bf16.msra.mxu0 %v2995_v45 }
 0x575   : > { %2167 = vmatprep.subr.bf16.mxu0 %v3000_v47 }
 0x578   : > { %2168 = vmatpush1.bf16.msra.mxu0 %v2998_v46 }
 0x63e   : > { %v2667_v25 = vpop.f32.mrb[8].mxu0 }
 0x63f   : > { %v2668_v27 = vpop.f32.mrb[9].mxu0 }
 0x640   : > { %v2669_v28 = vadd.f32 %v2668_v27, %v2667_v25  ;;  %v2670_v0 = vpop.f32.mrb[10].mxu0  ;;  %v3050_v27 = vld [vmem:[%s3910_s11 + $0x8] sm:$0xff] }
 0x641   : > { %v2671_v29 = vpop.f32.mrb[11].mxu0 }
 0x642   : > { %v1730_v30 = vadd.f32 %v2669_v28, %v2563_v26  ;;  %v2672_v39 = vadd.f32 %v2671_v29, %v2670_v0 }
 0x644   : > { %v1733_v31 = vadd.f32 %v2672_v39, %v2563_v26  ;;  %v1736_v32 = vadd.f32 %v1730_v30, %v3944_v35  ;;  %v3003_v35 = vld [vmem:[#allocation20 + $0x44] ss:$8 sps:$4 sm:$0xff]  }
 0x645   : > { %2169 = vmatprep.subr.bf16.mxu0 %v3003_v35 }
 0x646   : > { %v1737_v33 = vadd.f32 %v1733_v31, %v3947_v36  ;;  %v3001_v36 = vld [vmem:[#allocation20 + $0x40] ss:$8 sps:$4 sm:$0xff]  }
 0x647   : > { %2170 = vmatpush1.bf16.msra.mxu0 %v3001_v36 }
 0x648   : > { %v1738_v34 = vpack.c.bf16 %v1737_v33, %v1736_v32  ;;  %2171 = vmatprep.subr.bf16.mxu0 %v3006_v49 }
 0x64a   : > { %2010 = vmatmul.mubr.bf16.vlgmr.msra.gmra.mrb[20].mxu1 %v1738_v34 }
 0x64b   : > { %2172 = vmatpush1.bf16.msra.mxu0 %v3004_v51 }
 0x64c   : > { %2173 = vmatprep.subr.bf16.mxu0 %v3009_v52 }
 0x64f   : > { %2174 = vmatpush1.bf16.msra.mxu0 %v3007_v53 }
 0x650   : > { %2175 = vmatprep.subr.bf16.mxu0 %v3012_v54 }
 0x653   : > { %2176 = vmatpush1.bf16.msra.mxu0 %v3010_v55 }
 0x71d   : > { %v2011_v58 = vpop.f32.mrb[20].mxu1 }
 0x71e   : > { %v2032_v59 = vadd.f32 %v2025_v57, %v2011_v58  ;;  %v2013_v60 = vpop.f32.mrb[21].mxu1 }
 0x71f   : > { %v2015_v61 = vpop.f32.mrb[22].mxu1  ;;  %v2033_v4 = vadd.f32 %v2029_v3, %v2013_v60 }
 0x720   : > { %v2612_v62 = vmul.f32 -1.442695, %v2032_v59  ;;  %v2034_v63 = vadd.f32 %v2025_v57, %v2015_v61  ;;  %v2017_v1 = vpop.f32.mrb[23].mxu1 }
 0x721   : > { %v2035_v6 = vadd.f32 %v2029_v3, %v2017_v1 }
 0x722   : > { %3037 = vpow2.f32 %v2612_v62  ;;  %v2613_v2 = vmul.f32 -1.442695, %v2034_v63 }
 0x724   : > { %3039 = vpow2.f32 %v2613_v2 }
 0x725   : > { %3041 = vtanh.f32 %v2033_v4 }
 0x72c   : > { %v3038_v5 = vpop.eup %3037 }
 0x72d   : > { %v2042_v7 = vadd.f32 1.0, %v3038_v5 }
 0x72e   : > { %v3040_v8 = vpop.eup %3039 }
 0x72f   : > { %3043 = vrcp.f32 %v2042_v7  ;;  %v2043_v9 = vadd.f32 1.0, %v3040_v8  ;;  %v3042_v10 = vpop.eup %3041 }
 0x730   : > { %3045 = vtanh.f32 %v2035_v6 }
 0x731   : > { %3047 = vrcp.f32 %v2043_v9 }
 0x739   : > { %v3044_v11 = vpop.eup %3043 }
 0x73a   : > { %v3046_v12 = vpop.eup %3045  ;;  %v2050_v13 = vmul.f32 %v3044_v11, %v3042_v10 }
 0x73b   : > { %v3048_v14 = vpop.eup %3047 }
 0x73c   : > { %v2051_v15 = vmul.f32 %v3048_v14, %v3046_v12 }
 0x73e   : > { %v2052_v16 = vpack.c.bf16 %v2051_v15, %v2050_v13 }
 0x740   : > { %2194 = vmatmul.mubr.bf16.vlgmr.msra.gmra.mrb[12].mxu0 %v2052_v16 }
 0x813   : > { %v2195_v43 = vpop.f32.mrb[12].mxu0 }
 0x814   : > { %v2196_v19 = vadd.f32 %v2195_v43, %v2074_v17  ;;  %v2197_v20 = vpop.f32.mrb[13].mxu0 }
 0x815   : > { %v2198_v21 = vadd.f32 %v2197_v20, %v2078_v18  ;;  %v2199_v22 = vpop.f32.mrb[14].mxu0 }
 0x816   : > { %v2204_v44 = vadd.f32 %v3049_v42, %v2196_v19  ;;  %v2200_v23 = vadd.f32 %v2199_v22, %v2074_v17  ;;  %v2201_v24 = vpop.f32.mrb[15].mxu0 }
 0x817   : > { %2210 = vst [vmem:[%s722_s4] sm:$0xff] %v2198_v21  ;;  %v2202_v25 = vadd.f32 %v2201_v24, %v2078_v18 }
 0x818   : > { %v2206_v26 = vmul.f32 0.70710677, %v2204_v44  ;;  %v2205_v28 = vadd.f32 %v3050_v27, %v2200_v23 }
 0x819   : > { %2211 = vst [vmem:[%s722_s4 + $0x8] sm:$0xff] %v2202_v25 }
 0x81a   : > { %2208 = vst [vmem:[%s4077_s15] sm:$0xff] %v2206_v26  ;;  %v2207_v0 = vmul.f32 0.70710677, %v2205_v28 }
 0x81b   : > { %3322 = shalt.err (!%p3319_p0)
}
 0x81c   : > { %s3323_s11 = scalar_lea.hbm %s4086_s19, 256  ;;  %s3327_s27 = scalar_lea.hbm %s4288_s28, 512 }
 0x81d   : > { %p3324_p12 = scmp.ne.s32.totalorder %s4086_s19, %s3323_s11  ;;  %p3328_p4 = scmp.lt.u32.totalorder %s4086_s19, %s4288_s28 }
 0x81e   : > { %p3329_p7 = scmp.lt.u32.totalorder %s3327_s27, %s3323_s11  ;;  %p3331_p3 = scmp.lt.u32.totalorder %s3323_s11, %s4086_s19 }
 0x81f   : > { %p3325_p11 = pnand %p3324_p12, %p4290_p2 }
 0x820   : > { %p3330_p8 = por %p3329_p7, %p3328_p4 }
 0x821   : > { %p3326_p13 = pneg %p3325_p11 }
 0x822   : > { %p3332_p5 = por %p3331_p3, %p3330_p8 }
 0x824   : > { %p3333_p1 = pnand %p3332_p5, %p3326_p13 }
 0x826   : > { %3336 = shalt.err (!%p3333_p1)
}
 0x827   : > { %s3461_s13 = smov 128   ;;  %s3462_s14 = smov 8   ;;  %2209 = vst [vmem:[%s4077_s15 + $0x8] sm:$0xff] %v2207_v0 }
 0x828   : > { %2732 = dma.vmem_to_hbm [thread:$0]  (%p4290_p2), %s4080_s16, 256, %s4086_s19, %s2218_s6, %s3461_s13, %s3461_s13, %s3462_s14  }
 0x829   : > { %s2213_s18 = scalar_lea.sflag [#allocation8], %s3903_s21  ;;  %s3337_s24 = scalar_lea.vmem %s4088_s25, 256 }
 0x82a   : > { %p3338_p9 = scmp.ne.s32.totalorder %s4088_s25, %s3337_s24  ;;  %s3463_s17 = smov [#allocation21]  }
 0x82b   : > { %s3341_s3 = sshll.u32 %s3463_s17, 4  ;;  %s3342_s3 = int_to_ptr.vmem [resolvable:$false] %s3341_s3 }
 0x82c   : > { %p3339_p10 = pnand %p3338_p9, %p4290_p2  ;;  %s3343_s1 = scalar_lea.vmem %s3342_s3, 512 }
 0x82d   : > { %p3344_p0 = scmp.lt.s32.totalorder %s4088_s25, %s3342_s3  ;;  %p3345_p12 = scmp.lt.s32.totalorder %s3343_s1, %s3337_s24 }
 0x82e   : > { %p3340_p6 = pneg %p3339_p10 }
 0x82f   : > { %p3346_p11 = por %p3345_p12, %p3344_p0 }
 0x831   : > { %p3347_p13 = pnand %p3346_p11, %p3340_p6 }
 0x833   : > { %3350 = shalt.err (!%p3347_p13)
}
 0x834   : > { %s3351_s16 = scalar_lea.hbm %s4094_s10, 256  ;;  %s3355_s6 = scalar_lea.hbm %s4289_s29, 512 }
 0x835   : > { %p3352_p4 = scmp.ne.s32.totalorder %s4094_s10, %s3351_s16  ;;  %p3356_p3 = scmp.lt.u32.totalorder %s4094_s10, %s4289_s29 }
 0x836   : > { %p3357_p5 = scmp.lt.u32.totalorder %s3355_s6, %s3351_s16  ;;  %p3359_p9 = scmp.lt.u32.totalorder %s3351_s16, %s4094_s10 }
 0x837   : > { %p3353_p7 = pnand %p3352_p4, %p4290_p2 }
 0x838   : > { %p3358_p1 = por %p3357_p5, %p3356_p3 }
 0x839   : > { %p3354_p8 = pneg %p3353_p7 }
 0x83a   : > { %p3360_p10 = por %p3359_p9, %p3358_p1 }
 0x83c   : > { %p3361_p6 = pnand %p3360_p10, %p3354_p8 }
 0x83e   : > { %3364 = shalt.err (!%p3361_p6)
}
 0x83f   : > { %2731 = dma.vmem_to_hbm [thread:$0]  (%p4290_p2), %s4088_s25, 256, %s4094_s10, %s2213_s18, %s3461_s13, %s3461_s13, %s3462_s14  }
 0x840 PF: > { %s4291_s11 = sld [smem:[#allocation31_spill]]  ;;  %s4292_s7 = sld [smem:[#allocation42_spill]] }
 0x841   : > { %s4293_s23 = sld [smem:[#allocation35_spill]] }
 0x846   : > { %s2266_s27 = sand.u32 1, %s4291_s11   ;;  %p4294_p0 = scmp.ne.s32.totalorder %s4292_s7, 0 }
 0x847   : > { %p4295_p12 = scmp.ge.s32.totalorder %s4293_s23, 2  ;;  %s2267_s4 = scalar_lea.sflag [#allocation8], %s2266_s27 }
 0x849   : > { %p2765_p11 = pnand %p4295_p12, %p4294_p0 }
 0x84b   : > { %3410 = dma.done.wait (!%p2765_p11), %s2267_s4, 256  }
 0x84c   : > { %3412 = vsyncadd (!%p2765_p11), %s2267_s4, 4294967040  ;;  %s2276_s26 = scalar_lea.sflag [#allocation23], %s2266_s27 }
 0x84d   : > { %3414 = dma.done.wait (!%p2765_p11), %s2276_s26, 256  }
 0x84e   : > { %3416 = vsyncadd (!%p2765_p11), %s2276_s26, 4294967040  ;;  %s41_s23 = sadd.s32 1, %s4293_s23   ;;  %s4296_s18 = sld [smem:[#allocation32_spill]] }
 0x84f   : > { %p38_p13 = scmp.ge.s32.totalorder %s41_s23, 4   ;;  %s4297_s21 = sld [smem:[#allocation41_spill]] }
 0x850   : > { %s4298_s25 = sld [smem:[#allocation34_spill]]  ;;  %s4299_s22 = sld [smem:[#allocation38_spill]] }
 0x851   : > { %s4300_s19 = smov %s3427_s20  ;;  %40 = sbr.rel (!%p38_p13) target bundleno = 25 (0x19), region = 194 }
 0x855   : > { %s4301_s20 = smov %s4297_s21 }
 0x856   : > { %s4302_s21 = smov %s4298_s25 }
 0x858   :  { %2281 = vsyncpa [#allocation7], 1 }
 0x859   :  { %2283 = vsyncpa [#allocation7 + $0x1], 1 }
 0x85a   :  { %2284 = vsyncpa [#allocation10], 1 }
 0x85b   :  { %2286 = vsyncpa [#allocation10 + $0x1], 1 }
 0x85c   :  { %2287 = vsyncpa [#allocation13], 1 }
 0x85d   :  { %2288 = vsyncpa [#allocation16], 1 }
 0x85e   :  { %2289 = vsyncpa [#allocation19], 1 }
 0x85f   :  { %2290 = vsyncpa [#allocation8], 1 }
 0x860   :  { %2292 = vsyncpa [#allocation8 + $0x1], 1 }
 0x861   :  { %2293 = vsyncpa [#allocation23], 1 }
 0x862   :  { %2295 = vsyncpa [#allocation23 + $0x1], 1 }

</bundles_post_ra>
